<compile_context>
chip_gen: v6e
topology: v6e:2x2x1
jax: 0.10.0
libtpu: 0.0.40
codegen_flags: <defaults>
</compile_context>

<pallas_src>
import functools

import jax
import jax.numpy as jnp
import numpy as np
from jax.experimental import pallas as pl
from jax.experimental.pallas import tpu as pltpu

C_IN = 256
C_OUT = 1024
EPS = 1e-5
INV_SQRT2 = 0.7071067811865476


def fused_add_ln_linear_gelu_kernel(x1_ref, x2_ref, g_ref, b_ref, w_ref, wb_ref,
                                    o_ref, *, gelu_in_bf16):
    # residual add (f32)
    x = x1_ref[...] + x2_ref[...]                          # (tm, C_IN)

    # LayerNorm over the channel axis; centered (two-pass) variance for
    # numerical robustness.
    mean = jnp.mean(x, axis=-1, keepdims=True)
    xc = x - mean
    var = jnp.mean(xc * xc, axis=-1, keepdims=True)
    inv = jax.lax.rsqrt(var + EPS)
    xn = xc * inv * g_ref[...] + b_ref[...]                 # gamma/beta (1, C_IN)

    # Linear: bf16 operands on the MXU, f32 accumulation, f32 bias add.
    y = jnp.dot(xn.astype(jnp.bfloat16), w_ref[...].astype(jnp.bfloat16),
                preferred_element_type=jnp.float32) + wb_ref[...]

    # Exact GELU: 0.5 * y * (1 + erf(y / sqrt(2))), divide folded into a mul.
    if gelu_in_bf16:
        yb = y.astype(jnp.bfloat16)
        gel = 0.5 * yb * (1.0 + jax.lax.erf(yb * INV_SQRT2))
    else:
        gel = 0.5 * y * (1.0 + jax.lax.erf(y * INV_SQRT2))
    o_ref[...] = gel.astype(o_ref.dtype)


def fused_forward(x57, x71, gamma, beta, weight, bias, *, tm=None,
                  out_dtype=jnp.bfloat16, gelu_in_bf16=None):
    # x57/x71: (N, H, W, C_IN) f32; weight: (C_IN, C_OUT) f32 or bf16; bias: (C_OUT,)
    N, H, W, C = x57.shape
    assert C == C_IN
    rows = N * H * W

    # Generation-dependent defaults: bf16 GELU only where the VPU has a bf16
    # path (v6e/v7x); tm=112 is bf16-pack-clean (mult of 16), divides 784, and
    # keeps >= 2 steps per TensorCore on v7x for intra-core pipelining.
    if tm is None or gelu_in_bf16 is None:
        try:
            kind = jax.devices()[0].device_kind.lower()
        except Exception:  # pragma: no cover
            kind = ""
        if gelu_in_bf16 is None:
            gelu_in_bf16 = "v5" not in kind
        if tm is None:
            tm = 112
    assert rows % tm == 0, "row tile must divide N*H*W"

    x1 = x57.reshape(rows, C_IN)
    x2 = x71.reshape(rows, C_IN)
    g2 = gamma.reshape(1, C_IN)
    b2 = beta.reshape(1, C_IN)
    wb2 = bias.reshape(1, C_OUT)

    w_bytes = C_IN * C_OUT * weight.dtype.itemsize
    out_bytes = rows * C_OUT * np.dtype(out_dtype).itemsize
    cost = pl.CostEstimate(
        flops=2 * rows * C_IN * C_OUT,
        transcendentals=rows * C_OUT,                       # erf per output element
        bytes_accessed=2 * rows * C_IN * 4 + w_bytes + out_bytes,
    )

    kernel = functools.partial(fused_add_ln_linear_gelu_kernel,
                               gelu_in_bf16=bool(gelu_in_bf16))

    out = pl.pallas_call(
        kernel,
        out_shape=jax.ShapeDtypeStruct((rows, C_OUT), out_dtype),
        grid_spec=pl.GridSpec(
            grid=(rows // tm,),
            in_specs=[
                pl.BlockSpec((tm, C_IN), lambda i: (i, 0)),       # x1 tile
                pl.BlockSpec((tm, C_IN), lambda i: (i, 0)),       # x2 tile
                pl.BlockSpec((1, C_IN), lambda i: (0, 0)),        # gamma
                pl.BlockSpec((1, C_IN), lambda i: (0, 0)),        # beta
                pl.BlockSpec((C_IN, C_OUT), lambda i: (0, 0)),    # linear weight (in, out)
                pl.BlockSpec((1, C_OUT), lambda i: (0, 0)),       # linear bias
            ],
            out_specs=pl.BlockSpec((tm, C_OUT), lambda i: (i, 0)),
        ),
        compiler_params=pltpu.CompilerParams(
            dimension_semantics=("parallel",),
        ),
        cost_estimate=cost,
    )(x1, x2, g2, b2, weight, wb2)

    return out.reshape(N, H, W, C_OUT)


if __name__ == "__main__":
    key = jax.random.PRNGKey(0)
    k1, k2, k3, k4 = jax.random.split(key, 4)

    # inputs: matches the module's torch.Size([1, 28, 28, 256])
    x57 = jax.random.normal(k1, (1, 28, 28, C_IN), dtype=jnp.float32)
    x71 = jax.random.normal(k2, (1, 28, 28, C_IN), dtype=jnp.float32)

    # deterministic parameter init (shapes from the module's __init__)
    gamma = jnp.ones((C_IN,), dtype=jnp.float32)                 # LayerNorm weight
    beta = jnp.zeros((C_IN,), dtype=jnp.float32)                 # LayerNorm bias
    # Linear: PyTorch stores (out, in); we keep (in, out) for row-major matmul.
    bound = 1.0 / (C_IN ** 0.5)
    weight_f32 = jax.random.uniform(k3, (C_IN, C_OUT), dtype=jnp.float32,
                                    minval=-bound, maxval=bound)
    bias = jax.random.uniform(k4, (C_OUT,), dtype=jnp.float32,
                              minval=-bound, maxval=bound)

    # Persist the matmul weight in bf16 ONCE, outside the per-call hot path
    # (no per-call wrapper-side astype; the kernel astype is then a no-op).
    weight_bf16 = jax.device_put(weight_f32.astype(jnp.bfloat16))
    jax.block_until_ready(weight_bf16)

    out = fused_forward(x57, x71, gamma, beta, weight_bf16, bias)
    jax.block_until_ready(out)

    # reference check in plain JAX (f32 math; same bf16-quantized weight so the
    # remaining error is the in-kernel bf16 matmul operand / GELU / output).
    xr = (x57 + x71).reshape(-1, C_IN)
    mu = jnp.mean(xr, axis=-1, keepdims=True)
    var = jnp.mean((xr - mu) ** 2, axis=-1, keepdims=True)
    xn = (xr - mu) / jnp.sqrt(var + EPS) * gamma + beta
    yr = xn @ weight_bf16.astype(jnp.float32) + bias
    ref = (0.5 * yr * (1.0 + jax.lax.erf(yr * INV_SQRT2))).reshape(1, 28, 28, C_OUT)
    got = out.astype(jnp.float32)
    assert jnp.allclose(got, ref, atol=3e-2, rtol=2e-2), "mismatch vs reference"

    print("KERNEL_OK")
</pallas_src>

<mosaic_0001>
module attributes {stable_mosaic.version = 11 : i64} {
  func.func @fused_add_ln_linear_gelu_kernel(%arg0: i32, %arg1: memref<112x256xf32, #tpu.memory_space<vmem>>, %arg2: memref<112x256xf32, #tpu.memory_space<vmem>>, %arg3: memref<1x256xf32, #tpu.memory_space<vmem>>, %arg4: memref<1x256xf32, #tpu.memory_space<vmem>>, %arg5: memref<256x1024xbf16, #tpu.memory_space<vmem>>, %arg6: memref<1x1024xf32, #tpu.memory_space<vmem>>, %arg7: memref<112x1024xbf16, #tpu.memory_space<vmem>>) attributes {dimension_semantics = [#tpu.dimension_semantics<parallel>], iteration_bounds = array<i64: 7>, scalar_prefetch = 0 : i64, scratch_operands = 0 : i64, tpu.core_type = #tpu.core_type<tc>, window_params = [{transform_indices = @transform_0, window_bounds = array<i64: 112, 256>}, {transform_indices = @transform_1, window_bounds = array<i64: 112, 256>}, {pipeline_mode = #tpu.pipeline_mode<synchronous>, transform_indices = @transform_2, window_bounds = array<i64: 1, 256>}, {pipeline_mode = #tpu.pipeline_mode<synchronous>, transform_indices = @transform_3, window_bounds = array<i64: 1, 256>}, {pipeline_mode = #tpu.pipeline_mode<synchronous>, transform_indices = @transform_4, window_bounds = array<i64: 256, 1024>}, {pipeline_mode = #tpu.pipeline_mode<synchronous>, transform_indices = @transform_5, window_bounds = array<i64: 1, 1024>}, {transform_indices = @transform_6, window_bounds = array<i64: 112, 1024>}]} {
    %c0 = arith.constant 0 : index
    %c0_0 = arith.constant 0 : index
    %0 = vector.load %arg1[%c0, %c0_0] : memref<112x256xf32, #tpu.memory_space<vmem>>, vector<112x256xf32>
    %c0_1 = arith.constant 0 : index
    %c0_2 = arith.constant 0 : index
    %1 = vector.load %arg2[%c0_1, %c0_2] : memref<112x256xf32, #tpu.memory_space<vmem>>, vector<112x256xf32>
    %2 = arith.addf %0, %1 : vector<112x256xf32>
    %cst = arith.constant dense<0.000000e+00> : vector<112xf32>
    %3 = vector.multi_reduction <add>, %2, %cst [1] : vector<112x256xf32> to vector<112xf32>
    %4 = vector.shape_cast %3 : vector<112xf32> to vector<112x1xf32>
    %cst_3 = arith.constant 2.560000e+02 : f32
    %5 = vector.broadcast %cst_3 : f32 to vector<112x1xf32>
    %6 = arith.divf %4, %5 : vector<112x1xf32>
    %7 = vector.broadcast %6 : vector<112x1xf32> to vector<112x256xf32>
    %8 = arith.subf %2, %7 : vector<112x256xf32>
    %9 = arith.mulf %8, %8 : vector<112x256xf32>
    %cst_4 = arith.constant dense<0.000000e+00> : vector<112xf32>
    %10 = vector.multi_reduction <add>, %9, %cst_4 [1] : vector<112x256xf32> to vector<112xf32>
    %11 = vector.shape_cast %10 : vector<112xf32> to vector<112x1xf32>
    %cst_5 = arith.constant 2.560000e+02 : f32
    %12 = vector.broadcast %cst_5 : f32 to vector<112x1xf32>
    %13 = arith.divf %11, %12 : vector<112x1xf32>
    %cst_6 = arith.constant 9.99999974E-6 : f32
    %14 = vector.broadcast %cst_6 : f32 to vector<112x1xf32>
    %15 = arith.addf %13, %14 : vector<112x1xf32>
    %16 = math.rsqrt %15 : vector<112x1xf32>
    %17 = vector.broadcast %16 : vector<112x1xf32> to vector<112x256xf32>
    %18 = arith.mulf %8, %17 : vector<112x256xf32>
    %c0_7 = arith.constant 0 : index
    %c0_8 = arith.constant 0 : index
    %19 = vector.load %arg3[%c0_7, %c0_8] : memref<1x256xf32, #tpu.memory_space<vmem>>, vector<1x256xf32>
    %20 = vector.broadcast %19 : vector<1x256xf32> to vector<112x256xf32>
    %21 = arith.mulf %18, %20 : vector<112x256xf32>
    %c0_9 = arith.constant 0 : index
    %c0_10 = arith.constant 0 : index
    %22 = vector.load %arg4[%c0_9, %c0_10] : memref<1x256xf32, #tpu.memory_space<vmem>>, vector<1x256xf32>
    %23 = vector.broadcast %22 : vector<1x256xf32> to vector<112x256xf32>
    %24 = arith.addf %21, %23 : vector<112x256xf32>
    %25 = arith.truncf %24 : vector<112x256xf32> to vector<112x256xbf16>
    %c0_11 = arith.constant 0 : index
    %c0_12 = arith.constant 0 : index
    %26 = vector.load %arg5[%c0_11, %c0_12] : memref<256x1024xbf16, #tpu.memory_space<vmem>>, vector<256x1024xbf16>
    %cst_13 = arith.constant dense<0.000000e+00> : vector<112x1024xf32>
    %27 = tpu.matmul %25, %26, %cst_13 {dimension_numbers = #tpu.dot_dimension_numbers<[1], [0], [0], [1], [0, 0, 1, 1], [], []>} : vector<112x256xbf16>, vector<256x1024xbf16>, vector<112x1024xf32> -> vector<112x1024xf32>
    %c0_14 = arith.constant 0 : index
    %c0_15 = arith.constant 0 : index
    %28 = vector.load %arg6[%c0_14, %c0_15] : memref<1x1024xf32, #tpu.memory_space<vmem>>, vector<1x1024xf32>
    %29 = vector.broadcast %28 : vector<1x1024xf32> to vector<112x1024xf32>
    %30 = arith.addf %27, %29 : vector<112x1024xf32>
    %31 = arith.truncf %30 : vector<112x1024xf32> to vector<112x1024xbf16>
    %cst_16 = arith.constant 5.000000e-01 : bf16
    %32 = vector.broadcast %cst_16 : bf16 to vector<112x1024xbf16>
    %33 = arith.mulf %32, %31 : vector<112x1024xbf16>
    %cst_17 = arith.constant 7.070310e-01 : bf16
    %34 = vector.broadcast %cst_17 : bf16 to vector<112x1024xbf16>
    %35 = arith.mulf %31, %34 : vector<112x1024xbf16>
    %36 = math.erf %35 : vector<112x1024xbf16>
    %cst_18 = arith.constant 1.000000e+00 : bf16
    %37 = vector.broadcast %cst_18 : bf16 to vector<112x1024xbf16>
    %38 = arith.addf %37, %36 : vector<112x1024xbf16>
    %39 = arith.mulf %33, %38 : vector<112x1024xbf16>
    %c0_19 = arith.constant 0 : index
    %c0_20 = arith.constant 0 : index
    %40 = vector.load %arg7[%c0_19, %c0_20] : memref<112x1024xbf16, #tpu.memory_space<vmem>>, vector<112x1024xbf16>
    tpu.vector_store %arg7[%c0_19, %c0_20], %39 {strides = array<i32>} : memref<112x1024xbf16, #tpu.memory_space<vmem>>, vector<112x1024xbf16>,
    return
  }
  func.func @transform_0(%arg0: i32) -> (i32, i32) {
    %c0_i32 = arith.constant 0 : i32
    %c0_i32_0 = arith.constant 0 : i32
    return %arg0, %c0_i32 : i32, i32
  }
  func.func @transform_1(%arg0: i32) -> (i32, i32) {
    %c0_i32 = arith.constant 0 : i32
    %c0_i32_0 = arith.constant 0 : i32
    return %arg0, %c0_i32 : i32, i32
  }
  func.func @transform_2(%arg0: i32) -> (i32, i32) {
    %c0_i32 = arith.constant 0 : i32
    %c0_i32_0 = arith.constant 0 : i32
    %c0_i32_1 = arith.constant 0 : i32
    return %c0_i32, %c0_i32_0 : i32, i32
  }
  func.func @transform_3(%arg0: i32) -> (i32, i32) {
    %c0_i32 = arith.constant 0 : i32
    %c0_i32_0 = arith.constant 0 : i32
    %c0_i32_1 = arith.constant 0 : i32
    return %c0_i32, %c0_i32_0 : i32, i32
  }
  func.func @transform_4(%arg0: i32) -> (i32, i32) {
    %c0_i32 = arith.constant 0 : i32
    %c0_i32_0 = arith.constant 0 : i32
    %c0_i32_1 = arith.constant 0 : i32
    return %c0_i32, %c0_i32_0 : i32, i32
  }
  func.func @transform_5(%arg0: i32) -> (i32, i32) {
    %c0_i32 = arith.constant 0 : i32
    %c0_i32_0 = arith.constant 0 : i32
    %c0_i32_1 = arith.constant 0 : i32
    return %c0_i32, %c0_i32_0 : i32, i32
  }
  func.func @transform_6(%arg0: i32) -> (i32, i32) {
    %c0_i32 = arith.constant 0 : i32
    %c0_i32_0 = arith.constant 0 : i32
    return %arg0, %c0_i32 : i32, i32
  }
}

</mosaic_0001>

<bundles_post_ra>
// kernel: tpu_custom_call.1
= control target key start
LH: loop header
LB: loop body
LE: loop exit
PB: predicated region body
PF: predicated region fallthrough
CT: control target
= control target key end

     0   :  { %s4812_s0 = inlined_call_operand.hbm [shape: f32[784,256], index: 0, kind: input, shape index: {}]   ;;  %s4813_s1 = inlined_call_operand.hbm [shape: f32[784,256], index: 1, kind: input, shape index: {}]   ;;  %s4814_s2 = inlined_call_operand.hbm [shape: f32[1,256], index: 2, kind: input, shape index: {}]   ;;  %s4815_s3 = inlined_call_operand.hbm [shape: f32[1,256], index: 3, kind: input, shape index: {}]   ;;  %s4816_s4 = inlined_call_operand.hbm [shape: bf16[256,1024], index: 4, kind: input, shape index: {}]   ;;  %s4817_s5 = inlined_call_operand.hbm [shape: f32[1,1024], index: 5, kind: input, shape index: {}]   ;;  %s4818_s6 = inlined_call_operand.hbm [shape: bf16[784,1024], index: 6, kind: output, shape index: {}]  }
   0x1   :  { %4823 = sst [smem:[#allocation20_spill]] %s4812_s0 }
   0x2   :  { %4824 = sst [smem:[#allocation21_spill]] %s4814_s2 }
   0x3   :  { %4825 = sst [smem:[#allocation22_spill]] %s4815_s3 }
   0x4   :  { %11 = vsyncpa [#allocation3], 0 }
   0x5   :  { %13 = vsyncpa [#allocation3 + $0x1], 0 }
   0x6   :  { %14 = vsyncpa [#allocation6], 0 }
   0x7   :  { %16 = vsyncpa [#allocation6 + $0x1], 0 }
   0x8   :  { %17 = vsyncpa [#allocation9], 0 }
   0x9   :  { %18 = vsyncpa [#allocation12], 0 }
   0xa   :  { %19 = vsyncpa [#allocation4], 0 }
   0xb   :  { %21 = vsyncpa [#allocation4 + $0x1], 0  ;;  %s3561_s21 = smov 0   ;;  %s3563_s22 = smov 0  }
   0xc   :  { %s3565_s23 = smov 0   ;;  %s3567_s24 = smov 0  }
   0xd LB: > { %s3582_s25 = sadd.s32 4294967295, %s3511_s24   ;;  %s2816_s26 = sadd.s32 4294967294, %s3511_s24   ;;  %s3511_s24 = sphi %s3567_s24, %s4849_s24   ;;  %s3507_s23 = sphi %s3565_s23, %s4848_s23   ;;  %s3503_s22 = sphi %s3563_s22, %s4847_s22   ;;  %s3499_s21 = sphi %s3561_s21, %s4846_s21  }
   0xe   : > { %p47_p0 = scmp.ne.s32.totalorder %s3503_s22, %s3499_s21  ;;  %p4819_p1 = scmp.eq.s32.totalorder %s3582_s25, 0 }
   0xf   : > { %p187_p3 = scmp.eq.s32.totalorder %s2816_s26, 6  ;;  %p2817_p5 = scmp.ge.s32.totalorder %s3511_s24, 1 }
  0x10   : > { %p3591_p4 = por %p4819_p1, %p47_p0  ;;  %p194_p7 = scmp.lt.s32.totalorder %s3511_s24, 8 }
  0x11   : > { %p3596_p6 = por %p187_p3, %p47_p0  ;;  %s3513_s30 = smov [#allocation7]  }
  0x12   : > { %s4826_s27 = scalar_select %p3591_p4, 1, 0 }
  0x13   : > { %s4827_s28 = scalar_select %p3596_p6, 1, 0 }
  0x14   : > { %p3601_p8 = pnand %p2817_p5, %p194_p7  ;;  %s207_s7 = sshll.u32 %s3513_s30, 4  ;;  %s208_s7 = int_to_ptr.vmem [resolvable:$true] %s207_s7 }
  0x15   : > { %s3514_s8 = smov [#allocation8]   ;;  %s3515_s11 = smov [#allocation10]  }
  0x16   : > { %s4828_s29 = scalar_select %p3601_p8, 1, 0 }
  0x17   : > { %p3055_p9 = pneg %p3601_p8  ;;  %s218_s9 = sshll.u32 %s3514_s8, 4  ;;  %s219_s9 = int_to_ptr.vmem [resolvable:$true] %s218_s9 }
  0x18   : > { %s228_s12 = sshll.u32 %s3515_s11, 4  ;;  %s3282_s13 = scalar_lea.vmem %s208_s7, 32  ;;  %s3613_s12 = int_to_ptr.vmem [resolvable:$true] %s228_s12 }
  0x19   : > { %p3609_p10 = pnand %p3055_p9, %p4819_p1  ;;  %p3283_p12 = scmp.ne.s32.totalorder %s208_s7, %s3282_s13 }
  0x1a   : > { %p3290_p3 = scmp.lt.s32.totalorder %s208_s7, %s208_s7  ;;  %p3291_p5 = scmp.lt.s32.totalorder %s3282_s13, %s3282_s13 }
  0x1b   : > { %p3273_p11 = pneg %p3609_p10 }
  0x1c   : > { %p3292_p7 = por %p3291_p5, %p3290_p3 }
  0x1d   : > { %p3285_p13 = pnand %p3283_p12, %p3273_p11 }
  0x1f   : > { %p3286_p0 = pneg %p3285_p13 }
  0x21   : > { %p3293_p9 = pnand %p3292_p7, %p3286_p0 }
  0x23   : > { %3296 = shalt.err (!%p3293_p9)
}
  0x24   : > { %s4830_s2 = sld [smem:[#allocation21_spill]]  ;;  %s3308_s16 = scalar_lea.vmem %s219_s9, 32 }
  0x25   : > { %p3309_p1 = scmp.ne.s32.totalorder %s219_s9, %s3308_s16  ;;  %p3316_p12 = scmp.lt.s32.totalorder %s219_s9, %s219_s9 }
  0x26   : > { %p3317_p13 = scmp.lt.s32.totalorder %s3308_s16, %s3308_s16 }
  0x27   : > { %p3311_p2 = pnand %p3309_p1, %p3273_p11 }
  0x28   : > { %p3318_p4 = por %p3317_p13, %p3316_p12 }
  0x29   : > { %p3312_p6 = pneg %p3311_p2 }
  0x2a   : > { %3058 = dma.hbm_to_vmem [thread:$0]  (!%p3609_p10), %s4830_s2, 32, %s208_s7, [#allocation6]  }
  0x2b   : > { %p3319_p8 = pnand %p3318_p4, %p3312_p6 }
  0x2d   : > { %3322 = shalt.err (!%p3319_p8)
}
  0x2e   : > { %s4831_s3 = sld [smem:[#allocation22_spill]]  ;;  %s3334_s19 = scalar_lea.vmem %s3613_s12, 16384 }
  0x2f   : > { %p3335_p0 = scmp.ne.s32.totalorder %s3613_s12, %s3334_s19  ;;  %p3342_p3 = scmp.lt.s32.totalorder %s3613_s12, %s3613_s12 }
  0x30   : > { %p3343_p4 = scmp.lt.s32.totalorder %s3334_s19, %s3334_s19 }
  0x31   : > { %p3337_p1 = pnand %p3335_p0, %p3273_p11 }
  0x32   : > { %p3344_p6 = por %p3343_p4, %p3342_p3 }
  0x33   : > { %p3338_p2 = pneg %p3337_p1 }
  0x34   : > { %3061 = dma.hbm_to_vmem [thread:$0]  (!%p3609_p10), %s4831_s3, 32, %s219_s9, [#allocation9]  }
  0x35   : > { %p3345_p8 = pnand %p3344_p6, %p3338_p2 }
  0x37   : > { %3348 = shalt.err (!%p3345_p8)
}
  0x38   : > { %s3516_s20 = smov 512   ;;  %s3517_s26 = smov 32  }
  0x39   : > { %3064 = dma.hbm_to_vmem [thread:$0]  (!%p3609_p10), %s4816_s4, 16384, %s3613_s12, [#allocation9], %s3516_s20, %s3516_s20, %s3517_s26  }
  0x3a   : > { %s3518_s8 = smov [#allocation11]  }
  0x3b   : > { %s242_s9 = sshll.u32 %s3518_s8, 4  ;;  %s243_s9 = int_to_ptr.vmem [resolvable:$true] %s242_s9 }
  0x3c   : > { %s3360_s11 = scalar_lea.vmem %s243_s9, 128  ;;  %p3368_p12 = scmp.lt.s32.totalorder %s243_s9, %s243_s9 }
  0x3d   : > { %p3361_p5 = scmp.ne.s32.totalorder %s243_s9, %s3360_s11  ;;  %p3369_p13 = scmp.lt.s32.totalorder %s3360_s11, %s3360_s11 }
  0x3f   : > { %p3363_p7 = pnand %p3361_p5, %p3273_p11  ;;  %p3370_p0 = por %p3369_p13, %p3368_p12 }
  0x41   : > { %p3364_p9 = pneg %p3363_p7 }
  0x43   : > { %p3371_p1 = pnand %p3370_p0, %p3364_p9 }
  0x45   : > { %3374 = shalt.err (!%p3371_p1)
}
  0x46   : > { %3067 = dma.hbm_to_vmem [thread:$0]  (!%p3609_p10), %s4817_s5, 128, %s243_s9, [#allocation12]  }
  0x47   : > { %s3655_s12 = sadd.s32 1, %s3511_s24   ;;  %s34_s10 = sadd.s32 1, %s3507_s23 }
  0x48   : > { %s31_s15 = ssub.s32 %s3511_s24, %s3655_s12  ;;  %p41_p11 = scmp.ne.s32.totalorder %s3507_s23, %s3503_s22 }
  0x49   : > { %p32_p2 = scmp.eq.s32.totalorder %s31_s15, 0  ;;  %p42_p3 = scmp.eq.s32.totalorder %s3511_s24, 0 }
  0x4a   : > { %p4832_p4 = scmp.eq.s32.totalorder %s3582_s25, 6  ;;  %p3083_p8 = scmp.lt.s32.totalorder %s3511_s24, 7 }
  0x4b   : > { %s3671_s17 = scalar_select %p32_p2, %s3507_s23, %s34_s10  }
  0x4c   : > { %p3665_p6 = por %p4832_p4, %p41_p11  ;;  %p43_p5 = por %p42_p3, %p41_p11 }
  0x4d   : > { %s253_s18 = sand.u32 1, %s3507_s23   ;;  %s4822_s20 = smul.u32 3584, %s3511_s24 }
  0x4e   : > { %s3674_s19 = smul.u32 224, %s253_s18  ;;  %p3677_p10 = pnand %p3083_p8, %p43_p5 }
  0x4f   : > { %s4835_s0 = sld [smem:[#allocation20_spill]]  ;;  %s275_s13 = sand.u32 1, %s3511_s24  }
  0x50   : > { %s257_s9 = scalar_lea.vmem [#allocation2], %s3674_s19  ;;  %s3692_s14 = scalar_lea.sflag [#allocation3], %s253_s18 }
  0x51   : > { %s265_s11 = sshll.u32 %s257_s9, 4  ;;  %p3377_p9 = pneg %p3677_p10  ;;  %s3689_s11 = int_to_ptr.vmem [resolvable:$true] %s265_s11 }
  0x55   : > { %s3686_s8 = scalar_lea.hbm %s4835_s0, %s4822_s20  ;;  %s3380_s7 = scalar_lea.hbm %s4835_s0, 25088 }
  0x56   : > { %s3375_s10 = scalar_lea.hbm %s3686_s8, 3584  ;;  %p3381_p0 = scmp.lt.s32.totalorder %s3686_s8, %s4835_s0 }
  0x57   : > { %p3376_p7 = scmp.ne.s32.totalorder %s3686_s8, %s3375_s10  ;;  %p3382_p1 = scmp.lt.s32.totalorder %s3380_s7, %s3375_s10 }
  0x59   : > { %p3378_p12 = pnand %p3377_p9, %p3376_p7  ;;  %p3383_p11 = por %p3382_p1, %p3381_p0 }
  0x5b   : > { %p3379_p13 = pneg %p3378_p12 }
  0x5d   : > { %p3384_p2 = pnand %p3383_p11, %p3379_p13 }
  0x5f   : > { %3387 = shalt.err (!%p3384_p2)
}
  0x60   : > { %s3388_s18 = scalar_lea.vmem %s3689_s11, 3584  ;;  %s3519_s9 = smov [#allocation2]  }
  0x61   : > { %p3389_p3 = scmp.ne.s32.totalorder %s3689_s11, %s3388_s18  ;;  %s3393_s15 = sshll.u32 %s3519_s9, 4  ;;  %s3394_s15 = int_to_ptr.vmem [resolvable:$false] %s3393_s15 }
  0x62   : > { %s3395_s30 = scalar_lea.vmem %s3394_s15, 7168  ;;  %p3396_p5 = scmp.lt.s32.totalorder %s3689_s11, %s3394_s15 }
  0x63   : > { %p3391_p4 = pnand %p3389_p3, %p3377_p9  ;;  %p3397_p7 = scmp.lt.s32.totalorder %s3395_s30, %s3388_s18 }
  0x65   : > { %p3392_p8 = pneg %p3391_p4  ;;  %p3398_p12 = por %p3397_p7, %p3396_p5 }
  0x67   : > { %p3399_p0 = pnand %p3398_p12, %p3392_p8 }
  0x69   : > { %3402 = shalt.err (!%p3399_p0)
}
  0x6a   : > { %s3520_s2 = smov 256   ;;  %s3521_s20 = smov 16  }
  0x6b   : > { %3071 = dma.hbm_to_vmem [thread:$0]  (!%p3677_p10), %s3686_s8, 3584, %s3689_s11, %s3692_s14, %s3520_s2, %s3520_s2, %s3521_s20  }
  0x6c   : > { %s4836_s10 = smul.u32 3584, %s3511_s24  ;;  %s279_s15 = scalar_lea.vmem [#allocation5], %s3674_s19 }
  0x6d   : > { %s287_s30 = sshll.u32 %s279_s15, 4  ;;  %s276_s0 = scalar_lea.sflag [#allocation6], %s275_s13  ;;  %s3730_s30 = int_to_ptr.vmem [resolvable:$true] %s287_s30 }
  0x6e   : > { %s3727_s9 = scalar_lea.hbm %s4813_s1, %s4836_s10  ;;  %s3408_s14 = scalar_lea.hbm %s4813_s1, 25088 }
  0x6f   : > { %s3403_s3 = scalar_lea.hbm %s3727_s9, 3584  ;;  %p3409_p2 = scmp.lt.s32.totalorder %s3727_s9, %s4813_s1 }
  0x70   : > { %p3404_p13 = scmp.ne.s32.totalorder %s3727_s9, %s3403_s3  ;;  %p3410_p3 = scmp.lt.s32.totalorder %s3408_s14, %s3403_s3 }
  0x72   : > { %p3406_p1 = pnand %p3404_p13, %p3377_p9  ;;  %p3411_p4 = por %p3410_p3, %p3409_p2 }
  0x74   : > { %p3407_p11 = pneg %p3406_p1 }
  0x76   : > { %p3412_p8 = pnand %p3411_p4, %p3407_p11 }
  0x78   : > { %3415 = shalt.err (!%p3412_p8)
}
  0x79   : > { %s3416_s19 = scalar_lea.vmem %s3730_s30, 3584  ;;  %s3522_s13 = smov [#allocation5]  }
  0x7a   : > { %p3417_p5 = scmp.ne.s32.totalorder %s3730_s30, %s3416_s19  ;;  %s3421_s18 = sshll.u32 %s3522_s13, 4  ;;  %s3422_s18 = int_to_ptr.vmem [resolvable:$false] %s3421_s18 }
  0x7b   : > { %s3423_s15 = scalar_lea.vmem %s3422_s18, 7168  ;;  %p3424_p0 = scmp.lt.s32.totalorder %s3730_s30, %s3422_s18 }
  0x7c   : > { %p3419_p7 = pnand %p3417_p5, %p3377_p9  ;;  %p3425_p13 = scmp.lt.s32.totalorder %s3423_s15, %s3416_s19 }
  0x7e   : > { %p3420_p12 = pneg %p3419_p7  ;;  %p3426_p1 = por %p3425_p13, %p3424_p0 }
  0x80   : > { %p3427_p2 = pnand %p3426_p1, %p3420_p12 }
  0x82   : > { %3430 = shalt.err (!%p3427_p2)
}
  0x83   : > { %3074 = dma.hbm_to_vmem [thread:$0]  (!%p3677_p10), %s3727_s9, 3584, %s3730_s30, %s276_s0, %s3520_s2, %s3520_s2, %s3521_s20  }
  0x84   : > { %p4837_p9 = scmp.ne.s32.totalorder %s4828_s29, 0 }
  0x85   : > { %s3762_s3 = sand.u32 (!%p4837_p9), 1, %s3503_s22   ;;  %p4838_p11 = scmp.ne.s32.totalorder (!%p4837_p9), %s4826_s27, 0 }
  0x86   : > { %299 = sbr.rel (%p4837_p9) target bundleno = 833 (0x341), region = 44  ;;  %s302_s11 = scalar_lea.sflag (!%p4837_p9), [#allocation3], %s3762_s3 }
  0x87   : > { %s3031_s8 = smul.u32 (!%p4837_p9), 224, %s3762_s3 }
  0x89   : > { %s3766_s14 = scalar_lea.vmem (!%p4837_p9), [#allocation2], %s3031_s8 }
  0x8b   : > { %3474 = dma.done.wait (%p4838_p11), %s302_s11, 3584  }
  0x8c   : > { %3476 = vsyncadd (%p4838_p11), %s302_s11, 4294963712  ;;  %s310_s0 = sand.u32 1, %s3582_s25   ;;  %s3773_s26 = scalar_lea.vmem [#allocation5], %s3031_s8 }
  0x8d   : > { %s311_s29 = scalar_lea.sflag [#allocation6], %s310_s0 }
  0x8e   : > { %3478 = dma.done.wait (%p4838_p11), %s311_s29, 3584  }
  0x8f   : > { %3480 = vsyncadd (%p4838_p11), %s311_s29, 4294963712  ;;  %p4839_p10 = scmp.eq.s32.totalorder %s3582_s25, 0 }
  0x91   : > { %3482 = dma.done.wait (%p4839_p10), [#allocation6], 32   ;;  %p4840_p3 = pmov %p4839_p10 }
  0x93   : > { %3484 = vsyncadd (%p4840_p3), [#allocation6], 4294967264  ;;  %p4841_p4 = pmov %p4840_p3 }
  0x94   : > { %p4842_p8 = pmov %p4840_p3 }
  0x95   : > { %3486 = dma.done.wait (%p4841_p4), [#allocation9], 16416  }
  0x96   : > { %3488 = vsyncadd (%p4842_p8), [#allocation9], 4294950880  ;;  %p4843_p5 = pmov %p4840_p3 }
  0x97   : > { %p4844_p7 = pmov %p4840_p3 }
  0x98   : > { %3490 = dma.done.wait (%p4843_p5), [#allocation12], 128  }
  0x99   : > { %3492 = vsyncadd (%p4844_p7), [#allocation12], 4294967168  ;;  %v370_v0 = vld [vmem:[%s3766_s14] sm:$0xff]  ;;  %v371_v1 = vld [vmem:[%s3766_s14 + $0x8] sm:$0xff]  ;;  %s3032_s27 = smul.u32 448, %s3762_s3  ;;  %s2668_s7 = scalar_lea.sflag [#allocation4], %s3762_s3 }
  0x9a   : > { %v398_v2 = vld [vmem:[%s3773_s26] sm:$0xff]  ;;  %v399_v3 = vld [vmem:[%s3773_s26 + $0x8] sm:$0xff]  ;;  %v372_v10 = vld [vmem:[%s3766_s14 + $0x10] sm:$0xff]  ;;  %s3028_s20 = smul.u32 7168, %s3582_s25  ;;  %s3523_s13 = smov [#allocation13]  }
  0x9b   : > { %v3795_v4 = vadd.f32 %v398_v2, %v370_v0  ;;  %v374_v5 = vld [vmem:[%s3766_s14 + $0x20] sm:$0xff]  ;;  %v375_v6 = vld [vmem:[%s3766_s14 + $0x28] sm:$0xff]  ;;  %v3799_v7 = vadd.f32 %v399_v3, %v371_v1  ;;  %v373_v13 = vld [vmem:[%s3766_s14 + $0x18] sm:$0xff]  ;;  %s4418_s2 = scalar_lea.vmem [#allocation13], %s3032_s27  ;;  %s3435_s18 = sshll.u32 %s3523_s13, 4  ;;  %s3436_s18 = int_to_ptr.vmem [resolvable:$false] %s3435_s18 }
  0x9c   : > { %v402_v8 = vld [vmem:[%s3773_s26 + $0x20] sm:$0xff]  ;;  %v403_v9 = vld [vmem:[%s3773_s26 + $0x28] sm:$0xff]  ;;  %v400_v14 = vld [vmem:[%s3773_s26 + $0x10] sm:$0xff]  ;;  %s2682_s9 = sshll.u32 %s4418_s2, 4  ;;  %s4764_s10 = scalar_lea.hbm %s4818_s6, %s3028_s20  ;;  %s4766_s9 = int_to_ptr.vmem [resolvable:$true] %s2682_s9 }
  0x9d   : > { %v3804_v11 = vadd.f32 %v402_v8, %v374_v5  ;;  %v3806_v12 = vadd.f32 %v403_v9, %v375_v6  ;;  %v401_v15 = vld [vmem:[%s3773_s26 + $0x18] sm:$0xff]  ;;  %v454_v16 = vadd.f32 %v3799_v7, %v3795_v4  ;;  %v3813_v17 = vadd.f32 %v400_v14, %v372_v10  ;;  %v376_v19 = vld [vmem:[%s3766_s14 + $0x30] sm:$0xff]  ;;  %v378_v25 = vld [vmem:[%s3766_s14 + $0x40] sm:$0xff]  ;;  %s3431_s19 = scalar_lea.vmem %s4766_s9, 7168  ;;  %s3437_s15 = scalar_lea.vmem %s3436_s18, 14336 }
  0x9e   : > { %v3815_v18 = vadd.f32 %v401_v15, %v373_v13  ;;  %v377_v20 = vld [vmem:[%s3766_s14 + $0x38] sm:$0xff]  ;;  %v404_v21 = vld [vmem:[%s3773_s26 + $0x30] sm:$0xff]  ;;  %v379_v26 = vld [vmem:[%s3766_s14 + $0x48] sm:$0xff]  ;;  %p3432_p12 = scmp.ne.s32.totalorder %s4766_s9, %s3431_s19  ;;  %p3438_p1 = scmp.lt.s32.totalorder %s4766_s9, %s3436_s18 }
  0x9f   : > { %v460_v22 = vadd.f32 %v3806_v12, %v3804_v11  ;;  %v405_v23 = vld [vmem:[%s3773_s26 + $0x38] sm:$0xff]  ;;  %v3823_v24 = vadd.f32 %v404_v21, %v376_v19  ;;  %455 = vadd.xlane.f32.xlu0 %v454_v16  ;;  %v406_v29 = vld [vmem:[%s3773_s26 + $0x40] sm:$0xff]  ;;  %v407_v30 = vld [vmem:[%s3773_s26 + $0x48] sm:$0xff]  ;;  %p3439_p2 = scmp.lt.s32.totalorder %s3437_s15, %s3431_s19 }
  0xa0   : > { %v457_v27 = vadd.f32 %v3815_v18, %v3813_v17  ;;  %v3829_v28 = vadd.f32 %v405_v23, %v377_v20  ;;  %v380_v31 = vld [vmem:[%s3766_s14 + $0x50] sm:$0xff]  ;;  %v3834_v32 = vadd.f32 %v406_v29, %v378_v25  ;;  %v3836_v33 = vadd.f32 %v407_v30, %v379_v26  ;;  %v381_v34 = vld [vmem:[%s3766_s14 + $0x58] sm:$0xff]  ;;  %v382_v40 = vld [vmem:[%s3766_s14 + $0x60] sm:$0xff]  ;;  %p3433_p0 = pnand %p3432_p12, %p3665_p6 }
  0xa1   : > { %461 = vadd.xlane.f32.xlu1 %v460_v22  ;;  %v408_v35 = vld [vmem:[%s3773_s26 + $0x50] sm:$0xff]  ;;  %v409_v36 = vld [vmem:[%s3773_s26 + $0x58] sm:$0xff]  ;;  %v383_v41 = vld [vmem:[%s3766_s14 + $0x68] sm:$0xff]  ;;  %p3440_p9 = por %p3439_p2, %p3438_p1 }
  0xa2   : > { %v463_v37 = vadd.f32 %v3829_v28, %v3823_v24  ;;  %v3843_v38 = vadd.f32 %v408_v35, %v380_v31  ;;  %v3845_v39 = vadd.f32 %v409_v36, %v381_v34  ;;  %v410_v42 = vld [vmem:[%s3773_s26 + $0x60] sm:$0xff]  ;;  %v411_v43 = vld [vmem:[%s3773_s26 + $0x68] sm:$0xff]  ;;  %v384_v44 = vld [vmem:[%s3766_s14 + $0x70] sm:$0xff]  ;;  %v466_v46 = vadd.f32 %v3836_v33, %v3834_v32  ;;  %p3434_p13 = pneg %p3433_p0 }
  0xa3   : > { %v385_v45 = vld [vmem:[%s3766_s14 + $0x78] sm:$0xff]  ;;  %458 = vadd.xlane.f32.xlu0 %v457_v27  ;;  %v3855_v47 = vadd.f32 %v410_v42, %v382_v40  ;;  %v3857_v48 = vadd.f32 %v411_v43, %v383_v41  ;;  %v412_v49 = vld [vmem:[%s3773_s26 + $0x70] sm:$0xff]  ;;  %v386_v51 = vld [vmem:[%s3766_s14 + $0x80] sm:$0xff] }
  0xa4   : > { %v413_v50 = vld [vmem:[%s3773_s26 + $0x78] sm:$0xff]  ;;  %v469_v52 = vadd.f32 %v3845_v39, %v3843_v38  ;;  %v3864_v53 = vadd.f32 %v412_v49, %v384_v44  ;;  %v387_v55 = vld [vmem:[%s3766_s14 + $0x88] sm:$0xff]  ;;  %v414_v56 = vld [vmem:[%s3773_s26 + $0x80] sm:$0xff]  ;;  %p3441_p11 = pnand %p3440_p9, %p3434_p13 }
  0xa5   : > { %464 = vadd.xlane.f32.xlu1 %v463_v37  ;;  %v3866_v54 = vadd.f32 %v413_v50, %v385_v45  ;;  %v415_v57 = vld [vmem:[%s3773_s26 + $0x88] sm:$0xff]  ;;  %v388_v58 = vld [vmem:[%s3766_s14 + $0x90] sm:$0xff]  ;;  %v389_v59 = vld [vmem:[%s3766_s14 + $0x98] sm:$0xff]  ;;  %v472_v62 = vadd.f32 %v3857_v48, %v3855_v47  ;;  %v3877_v63 = vadd.f32 %v414_v56, %v386_v51 }
  0xa6   : > { %v416_v60 = vld [vmem:[%s3773_s26 + $0x90] sm:$0xff]  ;;  %v417_v61 = vld [vmem:[%s3773_s26 + $0x98] sm:$0xff]  ;;  %v3879_v0 = vadd.f32 %v415_v57, %v387_v55  ;;  %v390_v1 = vld [vmem:[%s3766_s14 + $0xa0] sm:$0xff] }
  0xa7   : > { %467 = vadd.xlane.f32.xlu0 %v466_v46  ;;  %v391_v2 = vld [vmem:[%s3766_s14 + $0xa8] sm:$0xff]  ;;  %v475_v3 = vadd.f32 %v3866_v54, %v3864_v53  ;;  %v3885_v5 = vadd.f32 %v416_v60, %v388_v58  ;;  %v3887_v6 = vadd.f32 %v417_v61, %v389_v59  ;;  %v418_v8 = vld [vmem:[%s3773_s26 + $0xa0] sm:$0xff]  ;;  %v392_v10 = vld [vmem:[%s3766_s14 + $0xb0] sm:$0xff] }
  0xa8   : > { %v419_v9 = vld [vmem:[%s3773_s26 + $0xa8] sm:$0xff]  ;;  %v393_v13 = vld [vmem:[%s3766_s14 + $0xb8] sm:$0xff]  ;;  %v420_v14 = vld [vmem:[%s3773_s26 + $0xb0] sm:$0xff]  ;;  %v478_v16 = vadd.f32 %v3879_v0, %v3877_v63  ;;  %v3897_v19 = vadd.f32 %v418_v8, %v390_v1 }
  0xa9   : > { %470 = vadd.xlane.f32.xlu1 %v469_v52  ;;  %v421_v15 = vld [vmem:[%s3773_s26 + $0xb8] sm:$0xff]  ;;  %v3899_v20 = vadd.f32 %v419_v9, %v391_v2  ;;  %v394_v21 = vld [vmem:[%s3766_s14 + $0xc0] sm:$0xff]  ;;  %v395_v22 = vld [vmem:[%s3766_s14 + $0xc8] sm:$0xff]  ;;  %v481_v23 = vadd.f32 %v3887_v6, %v3885_v5  ;;  %v3905_v25 = vadd.f32 %v420_v14, %v392_v10 }
  0xaa   : > { %v3907_v26 = vadd.f32 %v421_v15, %v393_v13  ;;  %v422_v27 = vld [vmem:[%s3773_s26 + $0xc0] sm:$0xff]  ;;  %v423_v29 = vld [vmem:[%s3773_s26 + $0xc8] sm:$0xff]  ;;  %v396_v30 = vld [vmem:[%s3766_s14 + $0xd0] sm:$0xff] }
  0xab   : > { %473 = vadd.xlane.f32.xlu0 %v472_v62  ;;  %v397_v31 = vld [vmem:[%s3766_s14 + $0xd8] sm:$0xff]  ;;  %v424_v34 = vld [vmem:[%s3773_s26 + $0xd0] sm:$0xff]  ;;  %v484_v36 = vadd.f32 %v3899_v20, %v3897_v19  ;;  %v3917_v37 = vadd.f32 %v422_v27, %v394_v21  ;;  %v3919_v40 = vadd.f32 %v423_v29, %v395_v22  ;;  %v829_v46 = vld [vmem:[#allocation10 + $0x1c0] sm:$0xff] }
  0xac   : > { %v425_v35 = vld [vmem:[%s3773_s26 + $0xd8] sm:$0xff]  ;;  %v487_v41 = vadd.f32 %v3907_v26, %v3905_v25  ;;  %v3923_v42 = vadd.f32 %v424_v34, %v396_v30  ;;  %v833_v49 = vld [vmem:[#allocation10 + $0x1e0] sm:$0xff]  ;;  %v830_v50 = vld [vmem:[#allocation10 + $0x1c8] sm:$0xff] }
  0xad   : > { %476 = vadd.xlane.f32.xlu1 %v475_v3  ;;  %v3925_v43 = vadd.f32 %v425_v35, %v397_v31  ;;  %v490_v44 = vadd.f32 %v3919_v40, %v3917_v37  ;;  %v2889_v51 = vcombine.high %v829_v46, %v833_v49  ;;  %v834_v52 = vld [vmem:[#allocation10 + $0x1e8] sm:$0xff]  ;;  %v2888_v55 = vcombine.low %v829_v46, %v833_v49  ;;  %v821_v56 = vld [vmem:[#allocation10 + $0x180] sm:$0xff] }
  0xae   : > { %v825_v57 = vld [vmem:[#allocation10 + $0x1a0] sm:$0xff]  ;;  %v2891_v58 = vcombine.high %v830_v50, %v834_v52  ;;  %v2890_v59 = vcombine.low %v830_v50, %v834_v52  ;;  %v822_v61 = vld [vmem:[#allocation10 + $0x188] sm:$0xff] }
  0xaf   : > { %479 = vadd.xlane.f32.xlu0 %v478_v16  ;;  %v493_v45 = vadd.f32 %v3925_v43, %v3923_v42  ;;  %v2881_v60 = vcombine.high %v821_v56, %v825_v57  ;;  %v826_v62 = vld [vmem:[#allocation10 + $0x1a8] sm:$0xff]  ;;  %v813_v1 = vld [vmem:[#allocation10 + $0x140] sm:$0xff]  ;;  %1583 = vmatprep.subr.bf16.mxu0 %v2889_v51  ;;  %v2880_v10 = vcombine.low %v821_v56, %v825_v57 }
  0xb0   : > { %v2883_v2 = vcombine.high %v822_v61, %v826_v62  ;;  %v817_v3 = vld [vmem:[#allocation10 + $0x160] sm:$0xff]  ;;  %v814_v8 = vld [vmem:[#allocation10 + $0x148] sm:$0xff]  ;;  %1686 = vmatprep.subr.bf16.mxu1 %v2891_v58  ;;  %1584 = vmatpush1.bf16.msra.mxu0 %v2888_v55  ;;  %v2882_v13 = vcombine.low %v822_v61, %v826_v62 }
  0xb1   : > { %482 = vadd.xlane.f32.xlu1 %v481_v23  ;;  %v818_v9 = vld [vmem:[#allocation10 + $0x168] sm:$0xff]  ;;  %1687 = vmatpush1.bf16.msra.mxu1 %v2890_v59  ;;  %v2873_v14 = vcombine.high %v813_v1, %v817_v3  ;;  %v805_v16 = vld [vmem:[#allocation10 + $0x100] sm:$0xff]  ;;  %v2872_v27 = vcombine.low %v813_v1, %v817_v3 }
  0xb2   : > { %1585 = vmatprep.subr.bf16.mxu0 %v2881_v60  ;;  %1688 = vmatprep.subr.bf16.mxu1 %v2883_v2  ;;  %v2875_v15 = vcombine.high %v814_v8, %v818_v9  ;;  %v809_v21 = vld [vmem:[#allocation10 + $0x120] sm:$0xff]  ;;  %v806_v22 = vld [vmem:[#allocation10 + $0x108] sm:$0xff]  ;;  %v2874_v29 = vcombine.low %v814_v8, %v818_v9 }
  0xb3   : > { %485 = vadd.xlane.f32.xlu0 %v484_v36  ;;  %v810_v23 = vld [vmem:[#allocation10 + $0x128] sm:$0xff]  ;;  %v2865_v30 = vcombine.high %v805_v16, %v809_v21  ;;  %v797_v34 = vld [vmem:[#allocation10 + $0xc0] sm:$0xff] }
  0xb4   : > { %1586 = vmatpush1.bf16.msra.mxu0 %v2880_v10  ;;  %v2867_v31 = vcombine.high %v806_v22, %v810_v23  ;;  %v801_v35 = vld [vmem:[#allocation10 + $0xe0] sm:$0xff]  ;;  %v798_v36 = vld [vmem:[#allocation10 + $0xc8] sm:$0xff] }
  0xb5   : > { %488 = vadd.xlane.f32.xlu1 %v487_v41  ;;  %1689 = vmatpush1.bf16.msra.mxu1 %v2882_v13  ;;  %v802_v41 = vld [vmem:[#allocation10 + $0xe8] sm:$0xff]  ;;  %v2857_v46 = vcombine.high %v797_v34, %v801_v35  ;;  %v789_v50 = vld [vmem:[#allocation10 + $0x80] sm:$0xff]  ;;  %v2856_v56 = vcombine.low %v797_v34, %v801_v35 }
  0xb6   : > { %1587 = vmatprep.subr.bf16.mxu0 %v2873_v14  ;;  %1690 = vmatprep.subr.bf16.mxu1 %v2875_v15  ;;  %v2859_v49 = vcombine.high %v798_v36, %v802_v41  ;;  %v793_v51 = vld [vmem:[#allocation10 + $0xa0] sm:$0xff]  ;;  %v790_v52 = vld [vmem:[#allocation10 + $0x88] sm:$0xff]  ;;  %v2858_v57 = vcombine.low %v798_v36, %v802_v41 }
  0xb7   : > { %491 = vadd.xlane.f32.xlu0 %v490_v44  ;;  %v2864_v44 = vcombine.low %v805_v16, %v809_v21  ;;  %v794_v55 = vld [vmem:[#allocation10 + $0xa8] sm:$0xff]  ;;  %v2849_v58 = vcombine.high %v789_v50, %v793_v51  ;;  %v781_v60 = vld [vmem:[#allocation10 + $0x40] sm:$0xff]  ;;  %v2848_v2 = vcombine.low %v789_v50, %v793_v51 }
  0xb8   : > { %1588 = vmatpush1.bf16.msra.mxu0 %v2872_v27  ;;  %v2851_v59 = vcombine.high %v790_v52, %v794_v55  ;;  %v785_v61 = vld [vmem:[#allocation10 + $0x60] sm:$0xff]  ;;  %v782_v62 = vld [vmem:[#allocation10 + $0x48] sm:$0xff]  ;;  %v2850_v3 = vcombine.low %v790_v52, %v794_v55 }
  0xb9   : > { %494 = vadd.xlane.f32.xlu1 %v493_v45  ;;  %1691 = vmatpush1.bf16.msra.mxu1 %v2874_v29  ;;  %v2866_v45 = vcombine.low %v806_v22, %v810_v23  ;;  %v786_v1 = vld [vmem:[#allocation10 + $0x68] sm:$0xff]  ;;  %v2841_v8 = vcombine.high %v781_v60, %v785_v61  ;;  %v773_v10 = vld [vmem:[#allocation10] sm:$0xff]  ;;  %v2840_v16 = vcombine.low %v781_v60, %v785_v61 }
  0xba   : > { %1589 = vmatprep.subr.bf16.mxu0 %v2865_v30  ;;  %1692 = vmatprep.subr.bf16.mxu1 %v2867_v31  ;;  %v2843_v9 = vcombine.high %v782_v62, %v786_v1  ;;  %v777_v13 = vld [vmem:[#allocation10 + $0x20] sm:$0xff]  ;;  %v774_v14 = vld [vmem:[#allocation10 + $0x8] sm:$0xff]  ;;  %v2842_v21 = vcombine.low %v782_v62, %v786_v1 }
  0xbb   : > { %v778_v15 = vld [vmem:[#allocation10 + $0x28] sm:$0xff]  ;;  %v2833_v22 = vcombine.high %v773_v10, %v777_v13  ;;  %v893_v27 = vld [vmem:[#allocation10 + $0x3c0] sm:$0xff]  ;;  %v2832_v34 = vcombine.low %v773_v10, %v777_v13 }
  0xbc   : > { %1590 = vmatpush1.bf16.msra.mxu0 %v2864_v44  ;;  %v2835_v23 = vcombine.high %v774_v14, %v778_v15  ;;  %v897_v29 = vld [vmem:[#allocation10 + $0x3e0] sm:$0xff]  ;;  %v894_v30 = vld [vmem:[#allocation10 + $0x3c8] sm:$0xff]  ;;  %v2834_v35 = vcombine.low %v774_v14, %v778_v15 }
  0xbd   : > { %1693 = vmatpush1.bf16.msra.mxu1 %v2866_v45  ;;  %1591 = vmatprep.subr.bf16.mxu0 %v2857_v46  ;;  %v898_v31 = vld [vmem:[#allocation10 + $0x3e8] sm:$0xff]  ;;  %v2953_v36 = vcombine.high %v893_v27, %v897_v29  ;;  %v2952_v44 = vcombine.low %v893_v27, %v897_v29 }
  0xbe   : > { %1694 = vmatprep.subr.bf16.mxu1 %v2859_v49  ;;  %v2955_v41 = vcombine.high %v894_v30, %v898_v31  ;;  %v2954_v45 = vcombine.low %v894_v30, %v898_v31 }
  0xc0   : > { %1592 = vmatpush1.bf16.msra.mxu0 %v2856_v56 }
  0xc1   : > { %1695 = vmatpush1.bf16.msra.mxu1 %v2858_v57  ;;  %1593 = vmatprep.subr.bf16.mxu0 %v2849_v58 }
  0xc2   : > { %1696 = vmatprep.subr.bf16.mxu1 %v2851_v59 }
  0xc4   : > { %1594 = vmatpush1.bf16.msra.mxu0 %v2848_v2 }
  0xc5   : > { %1697 = vmatpush1.bf16.msra.mxu1 %v2850_v3  ;;  %1595 = vmatprep.subr.bf16.mxu0 %v2841_v8 }
  0xc6   : > { %1698 = vmatprep.subr.bf16.mxu1 %v2843_v9 }
  0xc8   : > { %1596 = vmatpush1.bf16.msra.mxu0 %v2840_v16 }
  0xc9   : > { %1699 = vmatpush1.bf16.msra.mxu1 %v2842_v21  ;;  %1597 = vmatprep.subr.bf16.mxu0 %v2833_v22 }
  0xca   : > { %1700 = vmatprep.subr.bf16.mxu1 %v2835_v23 }
  0xcc   : > { %1598 = vmatpush1.bf16.msra.mxu0 %v2832_v34 }
  0xcd   : > { %1701 = vmatpush1.bf16.msra.mxu1 %v2834_v35  ;;  %1599 = vmatprep.subr.bf16.mxu0 %v2953_v36 }
  0xce   : > { %1702 = vmatprep.subr.bf16.mxu1 %v2955_v41 }
  0xd0   : > { %1600 = vmatpush2.bf16.msra.mxu0 %v2952_v44 }
  0xd1   : > { %1703 = vmatpush2.bf16.msra.mxu1 %v2954_v45 }
 0x128   : > { %v456_v46 = vpop.xlane.xlu0 %455 }
 0x129   : > { %v497_v49 = vmul.f32 0.00390625, %v456_v46 }
 0x12a   : > { %v462_v50 = vpop.xlane.xlu1 %461 }
 0x12b   : > { %v499_v51 = vmul.f32 0.00390625, %v462_v50  ;;  %v3932_v52 = vsub.f32 %v3795_v4, %v497_v49  ;;  %v3935_v55 = vsub.f32 %v3799_v7, %v497_v49 }
 0x12c   : > { %v459_v58 = vpop.xlane.xlu0 %458 }
 0x12d   : > { %v3938_v56 = vsub.f32 %v3804_v11, %v499_v51  ;;  %v3941_v57 = vsub.f32 %v3806_v12, %v499_v51  ;;  %v498_v59 = vmul.f32 0.00390625, %v459_v58  ;;  %v539_v61 = vmul.f32 %v3932_v52, %v3932_v52 }
 0x12e   : > { %v465_v60 = vpop.xlane.xlu1 %464  ;;  %v540_v62 = vmul.f32 %v3935_v55, %v3935_v55 }
 0x12f   : > { %v500_v4 = vmul.f32 0.00390625, %v465_v60  ;;  %v543_v7 = vmul.f32 %v3938_v56, %v3938_v56  ;;  %v544_v11 = vmul.f32 %v3941_v57, %v3941_v57  ;;  %v3952_v1 = vsub.f32 %v3813_v17, %v498_v59  ;;  %v885_v60 = vld [vmem:[#allocation10 + $0x380] sm:$0xff] }
 0x130   : > { %v3955_v12 = vsub.f32 %v3815_v18, %v498_v59  ;;  %v567_v2 = vadd.f32 %v540_v62, %v539_v61  ;;  %v468_v9 = vpop.xlane.xlu0 %467  ;;  %v889_v61 = vld [vmem:[#allocation10 + $0x3a0] sm:$0xff]  ;;  %v886_v62 = vld [vmem:[#allocation10 + $0x388] sm:$0xff] }
 0x131   : > { %v3958_v3 = vsub.f32 %v3823_v24, %v500_v4  ;;  %v3961_v8 = vsub.f32 %v3829_v28, %v500_v4  ;;  %v501_v10 = vmul.f32 0.00390625, %v468_v9  ;;  %v573_v14 = vadd.f32 %v544_v11, %v543_v7  ;;  %v890_v9 = vld [vmem:[#allocation10 + $0x3a8] sm:$0xff] }
 0x132   : > { %568 = vadd.xlane.f32.xlu0 %v567_v2  ;;  %v471_v13 = vpop.xlane.xlu1 %470  ;;  %v541_v15 = vmul.f32 %v3952_v1, %v3952_v1  ;;  %v542_v17 = vmul.f32 %v3955_v12, %v3955_v12  ;;  %v2945_v2 = vcombine.high %v885_v60, %v889_v61 }
 0x133   : > { %v502_v18 = vmul.f32 0.00390625, %v471_v13  ;;  %v545_v16 = vmul.f32 %v3958_v3, %v3958_v3  ;;  %v546_v24 = vmul.f32 %v3961_v8, %v3961_v8  ;;  %v3972_v28 = vsub.f32 %v3834_v32, %v501_v10 }
 0x134   : > { %v3975_v21 = vsub.f32 %v3836_v33, %v501_v10  ;;  %v570_v22 = vadd.f32 %v542_v17, %v541_v15  ;;  %v474_v29 = vpop.xlane.xlu0 %473  ;;  %v2947_v17 = vcombine.high %v886_v62, %v890_v9  ;;  %1601 = vmatprep.subr.bf16.mxu0 %v2945_v2  ;;  %v873_v2 = vld [vmem:[#allocation10 + $0x320] sm:$0xff] }
 0x135   : > { %v3978_v23 = vsub.f32 %v3843_v38, %v502_v18  ;;  %v3981_v27 = vsub.f32 %v3845_v39, %v502_v18  ;;  %v503_v30 = vmul.f32 0.00390625, %v474_v29  ;;  %v576_v34 = vadd.f32 %v546_v24, %v545_v16 }
 0x136   : > { %574 = vadd.xlane.f32.xlu0 %v573_v14  ;;  %571 = vadd.xlane.f32.xlu1 %v570_v22  ;;  %v477_v31 = vpop.xlane.xlu1 %476  ;;  %v547_v32 = vmul.f32 %v3972_v28, %v3972_v28  ;;  %v548_v33 = vmul.f32 %v3975_v21, %v3975_v21  ;;  %v2944_v24 = vcombine.low %v885_v60, %v889_v61 }
 0x137   : > { %v504_v35 = vmul.f32 0.00390625, %v477_v31  ;;  %v549_v38 = vmul.f32 %v3978_v23, %v3978_v23  ;;  %v550_v39 = vmul.f32 %v3981_v27, %v3981_v27  ;;  %v3992_v36 = vsub.f32 %v3855_v47, %v503_v30  ;;  %1704 = vmatprep.subr.bf16.mxu1 %v2947_v17 }
 0x138   : > { %v3995_v41 = vsub.f32 %v3857_v48, %v503_v30  ;;  %v579_v44 = vadd.f32 %v548_v33, %v547_v32  ;;  %v480_v49 = vpop.xlane.xlu0 %479  ;;  %v2946_v29 = vcombine.low %v886_v62, %v890_v9  ;;  %1602 = vmatpush2.bf16.msra.mxu0 %v2944_v24  ;;  %v877_v32 = vld [vmem:[#allocation10 + $0x340] sm:$0xff]  ;;  %v870_v9 = vld [vmem:[#allocation10 + $0x308] sm:$0xff] }
 0x139   : > { %v3998_v45 = vsub.f32 %v3864_v53, %v504_v35  ;;  %v4001_v46 = vsub.f32 %v3866_v54, %v504_v35  ;;  %v505_v50 = vmul.f32 0.00390625, %v480_v49  ;;  %v582_v58 = vadd.f32 %v550_v39, %v549_v38  ;;  %v881_v33 = vld [vmem:[#allocation10 + $0x360] sm:$0xff]  ;;  %v878_v35 = vld [vmem:[#allocation10 + $0x348] sm:$0xff] }
 0x13a   : > { %577 = vadd.xlane.f32.xlu1 %v576_v34  ;;  %580 = vadd.xlane.f32.xlu0 %v579_v44  ;;  %v483_v51 = vpop.xlane.xlu1 %482  ;;  %v551_v47 = vmul.f32 %v3992_v36, %v3992_v36  ;;  %v552_v48 = vmul.f32 %v3995_v41, %v3995_v41 }
 0x13b   : > { %v506_v59 = vmul.f32 0.00390625, %v483_v51  ;;  %v553_v53 = vmul.f32 %v3998_v45, %v3998_v45  ;;  %v554_v54 = vmul.f32 %v4001_v46, %v4001_v46  ;;  %v4012_v4 = vsub.f32 %v3877_v63, %v505_v50  ;;  %1705 = vmatpush2.bf16.msra.mxu1 %v2946_v29  ;;  %v862_v29 = vld [vmem:[#allocation10 + $0x2c8] sm:$0xff] }
 0x13c   : > { %v4015_v7 = vsub.f32 %v3879_v0, %v505_v50  ;;  %v585_v11 = vadd.f32 %v552_v48, %v551_v47  ;;  %v486_v14 = vpop.xlane.xlu0 %485  ;;  %v2937_v50 = vcombine.high %v877_v32, %v881_v33 }
 0x13d   : > { %v4018_v10 = vsub.f32 %v3885_v5, %v506_v59  ;;  %v4021_v13 = vsub.f32 %v3887_v6, %v506_v59  ;;  %v588_v15 = vadd.f32 %v554_v54, %v553_v53  ;;  %v507_v18 = vmul.f32 0.00390625, %v486_v14 }
 0x13e   : > { %583 = vadd.xlane.f32.xlu1 %v582_v58  ;;  %586 = vadd.xlane.f32.xlu0 %v585_v11  ;;  %v489_v63 = vpop.xlane.xlu1 %488  ;;  %v555_v0 = vmul.f32 %v4012_v4, %v4012_v4  ;;  %v556_v16 = vmul.f32 %v4015_v7, %v4015_v7  ;;  %v2936_v53 = vcombine.low %v877_v32, %v881_v33  ;;  %v869_v11 = vld [vmem:[#allocation10 + $0x300] sm:$0xff]  ;;  %v866_v32 = vld [vmem:[#allocation10 + $0x2e8] sm:$0xff] }
 0x13f   : > { %v508_v22 = vmul.f32 0.00390625, %v489_v63  ;;  %v557_v5 = vmul.f32 %v4018_v10, %v4018_v10  ;;  %v558_v6 = vmul.f32 %v4021_v13, %v4021_v13  ;;  %v4032_v30 = vsub.f32 %v3897_v19, %v507_v18  ;;  %v882_v19 = vld [vmem:[#allocation10 + $0x368] sm:$0xff]  ;;  %1603 = vmatprep.subr.bf16.mxu0 %v2937_v50  ;;  %v853_v50 = vld [vmem:[#allocation10 + $0x280] sm:$0xff] }
 0x140   : > { %v4035_v31 = vsub.f32 %v3899_v20, %v507_v18  ;;  %v591_v34 = vadd.f32 %v556_v16, %v555_v0  ;;  %v492_v44 = vpop.xlane.xlu0 %491  ;;  %v2938_v62 = vcombine.low %v878_v35, %v882_v19  ;;  %1604 = vmatpush2.bf16.msra.mxu0 %v2936_v53  ;;  %v2929_v18 = vcombine.high %v869_v11, %v873_v2  ;;  %v846_v53 = vld [vmem:[#allocation10 + $0x248] sm:$0xff] }
 0x141   : > { %v4038_v38 = vsub.f32 %v3905_v25, %v508_v22  ;;  %v4041_v39 = vsub.f32 %v3907_v26, %v508_v22  ;;  %v594_v49 = vadd.f32 %v558_v6, %v557_v5  ;;  %v509_v51 = vmul.f32 0.00390625, %v492_v44  ;;  %v861_v5 = vld [vmem:[#allocation10 + $0x2c0] sm:$0xff] }
 0x142   : > { %589 = vadd.xlane.f32.xlu1 %v588_v15  ;;  %592 = vadd.xlane.f32.xlu0 %v591_v34  ;;  %v495_v20 = vpop.xlane.xlu1 %494  ;;  %v559_v58 = vmul.f32 %v4032_v30, %v4032_v30  ;;  %v560_v47 = vmul.f32 %v4035_v31, %v4035_v31  ;;  %v2939_v25 = vcombine.high %v878_v35, %v882_v19  ;;  %v865_v6 = vld [vmem:[#allocation10 + $0x2e0] sm:$0xff] }
 0x143   : > { %v510_v48 = vmul.f32 0.00390625, %v495_v20  ;;  %v561_v26 = vmul.f32 %v4038_v38, %v4038_v38  ;;  %v562_v59 = vmul.f32 %v4041_v39, %v4041_v39  ;;  %v4052_v54 = vsub.f32 %v3917_v37, %v509_v51  ;;  %v874_v37 = vld [vmem:[#allocation10 + $0x328] sm:$0xff]  ;;  %1605 = vmatprep.subr.bf16.mxu0 %v2929_v18  ;;  %v857_v19 = vld [vmem:[#allocation10 + $0x2a0] sm:$0xff] }
 0x144   : > { %v4055_v60 = vsub.f32 %v3919_v40, %v509_v51  ;;  %v597_v61 = vadd.f32 %v560_v47, %v559_v58  ;;  %1706 = vmatprep.subr.bf16.mxu1 %v2939_v25  ;;  %v2931_v0 = vcombine.high %v870_v9, %v874_v37  ;;  %v2928_v16 = vcombine.low %v869_v11, %v873_v2  ;;  %v854_v51 = vld [vmem:[#allocation10 + $0x288] sm:$0xff]  ;;  %v841_v18 = vld [vmem:[#allocation10 + $0x220] sm:$0xff] }
 0x145   : > { %v4058_v14 = vsub.f32 %v3923_v42, %v510_v48  ;;  %v4061_v15 = vsub.f32 %v3925_v43, %v510_v48  ;;  %v600_v17 = vadd.f32 %v562_v59, %v561_v26  ;;  %v563_v40 = vmul.f32 %v4052_v54, %v4052_v54  ;;  %1707 = vmatpush2.bf16.msra.mxu1 %v2938_v62  ;;  %v858_v58 = vld [vmem:[#allocation10 + $0x2a8] sm:$0xff]  ;;  %v845_v26 = vld [vmem:[#allocation10 + $0x240] sm:$0xff] }
 0x146   : > { %595 = vadd.xlane.f32.xlu1 %v594_v49  ;;  %598 = vadd.xlane.f32.xlu0 %v597_v61  ;;  %v564_v63 = vmul.f32 %v4055_v60, %v4055_v60  ;;  %v2930_v22 = vcombine.low %v870_v9, %v874_v37  ;;  %v2921_v34 = vcombine.high %v861_v5, %v865_v6  ;;  %v849_v59 = vld [vmem:[#allocation10 + $0x260] sm:$0xff]  ;;  %v850_v62 = vld [vmem:[#allocation10 + $0x268] sm:$0xff] }
 0x147   : > { %v565_v42 = vmul.f32 %v4058_v14, %v4058_v14  ;;  %v566_v43 = vmul.f32 %v4061_v15, %v4061_v15  ;;  %1708 = vmatprep.subr.bf16.mxu1 %v2931_v0  ;;  %1606 = vmatpush2.bf16.msra.mxu0 %v2928_v16  ;;  %v2923_v35 = vcombine.high %v862_v29, %v866_v32  ;;  %v838_v37 = vld [vmem:[#allocation10 + $0x208] sm:$0xff]  ;;  %v4071_v16 = vld [vmem:[#allocation10 + $0x1d0] sm:$0xff] }
 0x148   : > { %v603_v24 = vadd.f32 %v564_v63, %v563_v40  ;;  %v2920_v44 = vcombine.low %v861_v5, %v865_v6  ;;  %1607 = vmatprep.subr.bf16.mxu0 %v2921_v34  ;;  %v2922_v49 = vcombine.low %v862_v29, %v866_v32  ;;  %v2913_v20 = vcombine.high %v853_v50, %v857_v19  ;;  %v842_v63 = vld [vmem:[#allocation10 + $0x228] sm:$0xff]  ;;  %v4079_v6 = vld [vmem:[#allocation10 + $0x1f8] sm:$0xff] }
 0x149   : > { %v606_v33 = vadd.f32 %v566_v43, %v565_v42  ;;  %1709 = vmatpush2.bf16.msra.mxu1 %v2930_v22  ;;  %v2915_v47 = vcombine.high %v854_v51, %v858_v58  ;;  %v2912_v25 = vcombine.low %v853_v50, %v857_v19  ;;  %v2914_v48 = vcombine.low %v854_v51, %v858_v58  ;;  %v4075_v22 = vld [vmem:[#allocation10 + $0x1d8] sm:$0xff] }
 0x14a   : > { %601 = vadd.xlane.f32.xlu1 %v600_v17  ;;  %604 = vadd.xlane.f32.xlu0 %v603_v24  ;;  %v2905_v61 = vcombine.high %v845_v26, %v849_v59  ;;  %v2907_v11 = vcombine.high %v846_v53, %v850_v62  ;;  %v2904_v2 = vcombine.low %v845_v26, %v849_v59  ;;  %v837_v17 = vld [vmem:[#allocation10 + $0x200] sm:$0xff]  ;;  %v4073_v24 = vld [vmem:[#allocation10 + $0x1f0] sm:$0xff] }
 0x14b   : > { %1710 = vmatprep.subr.bf16.mxu1 %v2923_v35  ;;  %1608 = vmatpush2.bf16.msra.mxu0 %v2920_v44  ;;  %v2906_v9 = vcombine.low %v846_v53, %v850_v62  ;;  %v2897_v40 = vcombine.high %v837_v17, %v841_v18  ;;  %v2899_v0 = vcombine.high %v838_v37, %v842_v63 }
 0x14c   : > { %1609 = vmatprep.subr.bf16.mxu0 %v2913_v20  ;;  %v2896_v42 = vcombine.low %v837_v17, %v841_v18  ;;  %v2898_v43 = vcombine.low %v838_v37, %v842_v63  ;;  %v2893_v5 = vcombine.high %v4071_v16, %v4073_v24  ;;  %v2892_v29 = vcombine.low %v4071_v16, %v4073_v24 }
 0x14d   : > { %1711 = vmatpush2.bf16.msra.mxu1 %v2922_v49  ;;  %v2894_v34 = vcombine.low %v4075_v22, %v4079_v6  ;;  %v2895_v32 = vcombine.high %v4075_v22, %v4079_v6  ;;  %v681_v20 = vlaneseq  ;;  %v807_v6 = vld [vmem:[#allocation10 + $0x110] sm:$0xff] }
 0x14e   : > { %607 = vadd.xlane.f32.xlu1 %v606_v33  ;;  %1712 = vmatprep.subr.bf16.mxu1 %v2915_v47 }
 0x14f   : > { %1610 = vmatpush2.bf16.msra.mxu0 %v2912_v25  ;;  %v4087_v53 = vshrl.u32 %v681_v20, 7 }
 0x150   : > { %1611 = vmatprep.subr.bf16.mxu0 %v2905_v61 }
 0x151   : > { %1713 = vmatpush2.bf16.msra.mxu1 %v2914_v48  ;;  %v4090_v18 = vsub.s32 1, %v4087_v53  ;;  %v4093_v63 = vsub.s32 0, %v4087_v53 }
 0x152   : > { %1714 = vmatprep.subr.bf16.mxu1 %v2907_v11 }
 0x153   : > { %1612 = vmatpush2.bf16.msra.mxu0 %v2904_v2 }
 0x154   : > { %1613 = vmatprep.subr.bf16.mxu0 %v2897_v40  ;;  %v679_v40 = vld [vmem:[#allocation7] sm:$0x3] }
 0x155   : > { %1715 = vmatpush2.bf16.msra.mxu1 %v2906_v9 }
 0x156   : > { %1716 = vmatprep.subr.bf16.mxu1 %v2899_v0 }
 0x157   : > { %1614 = vmatpush2.bf16.msra.mxu0 %v2896_v42 }
 0x158   : > { %1789 = vmatprep.subr.bf16.mxu0 %v2893_v5 }
 0x159   : > { %1717 = vmatpush2.bf16.msra.mxu1 %v2898_v43 }
 0x15a   : > { %1892 = vmatprep.subr.bf16.mxu1 %v2895_v32 }
 0x1bb   : > { %v569_v33 = vpop.xlane.xlu0 %568 }
 0x1bc   : > { %v609_v35 = vmul.f32 0.00390625, %v569_v33  ;;  %v4096_v33 = vrot.slane %v679_v40, %v4090_v18 }
 0x1be   : > { %v623_v44 = vadd.f32 1e-05, %v609_v35 }
 0x1bf   : > { %v572_v49 = vpop.xlane.xlu1 %571  ;;  %v575_v50 = vpop.xlane.xlu0 %574 }
 0x1c0   : > { %3131 = vrsqrt.f32 %v623_v44  ;;  %v610_v19 = vmul.f32 0.00390625, %v572_v49  ;;  %v611_v51 = vmul.f32 0.00390625, %v575_v50  ;;  %v719_v49 = vld [vmem:[#allocation8] sm:$0x3] }
 0x1c2   : > { %v624_v58 = vadd.f32 1e-05, %v610_v19  ;;  %v625_v47 = vadd.f32 1e-05, %v611_v51  ;;  %v4101_v19 = vrot.slane %v679_v40, %v4093_v63 }
 0x1c3   : > { %v578_v25 = vpop.xlane.xlu1 %577  ;;  %v581_v48 = vpop.xlane.xlu0 %580 }
 0x1c4   : > { %3133 = vrsqrt.f32 %v624_v58  ;;  %v612_v26 = vmul.f32 0.00390625, %v578_v25  ;;  %v613_v59 = vmul.f32 0.00390625, %v581_v48  ;;  %v4105_v48 = vrot.slane %v719_v49, %v4090_v18 }
 0x1c5   : > { %3135 = vrsqrt.f32 %v625_v47 }
 0x1c6   : > { %v626_v61 = vadd.f32 1e-05, %v612_v26  ;;  %v627_v62 = vadd.f32 1e-05, %v613_v59  ;;  %v4107_v26 = vld [vmem:[#allocation10 + $0x190] sm:$0xff] }
 0x1c7   : > { %v584_v11 = vpop.xlane.xlu1 %583  ;;  %v587_v2 = vpop.xlane.xlu0 %586 }
 0x1c8   : > { %3137 = vrsqrt.f32 %v626_v61  ;;  %v614_v9 = vmul.f32 0.00390625, %v584_v11  ;;  %v615_v17 = vmul.f32 0.00390625, %v587_v2  ;;  %v4116_v11 = vld [vmem:[#allocation10 + $0x198] sm:$0xff] }
 0x1c9   : > { %3139 = vrsqrt.f32 %v627_v62  ;;  %v4114_v62 = vrot.slane %v719_v49, %v4093_v63  ;;  %v4118_v2 = vld [vmem:[#allocation10 + $0x1b8] sm:$0xff] }
 0x1ca   : > { %v628_v37 = vadd.f32 1e-05, %v614_v9  ;;  %v629_v5 = vadd.f32 1e-05, %v615_v17 }
 0x1cb   : > { %v590_v0 = vpop.xlane.xlu1 %589  ;;  %v593_v32 = vpop.xlane.xlu0 %592 }
 0x1cc   : > { %3141 = vrsqrt.f32 %v628_v37  ;;  %v616_v42 = vmul.f32 0.00390625, %v590_v0  ;;  %v617_v20 = vmul.f32 0.00390625, %v593_v32 }
 0x1cd   : > { %v3132_v43 = vpop.eup %3131 }
 0x1ce   : > { %v630_v35 = vadd.f32 1e-05, %v616_v42  ;;  %v652_v44 = vmul.f32 %v3132_v43, %v3935_v55  ;;  %v651_v50 = vmul.f32 %v3132_v43, %v3932_v52  ;;  %v4109_v55 = vld [vmem:[#allocation10 + $0x1b0] sm:$0xff]  ;;  %v631_v40 = vadd.f32 1e-05, %v617_v20 }
 0x1cf   : > { %v596_v51 = vpop.xlane.xlu1 %595 }
 0x1d0   : > { %3143 = vrsqrt.f32 %v630_v35  ;;  %v618_v58 = vmul.f32 0.00390625, %v596_v51  ;;  %v692_v25 = vmul.f32 %v4096_v33, %v652_v44  ;;  %v691_v61 = vmul.f32 %v4101_v19, %v651_v50 }
 0x1d1   : > { %v3134_v47 = vpop.eup %3133  ;;  %3145 = vrsqrt.f32 %v629_v5  ;;  %v599_v5 = vpop.xlane.xlu0 %598  ;;  %v2887_v44 = vcombine.high %v4116_v11, %v4118_v2 }
 0x1d2   : > { %v3136_v59 = vpop.eup %3135  ;;  %v654_v52 = vmul.f32 %v3134_v47, %v3955_v12  ;;  %v632_v9 = vadd.f32 1e-05, %v618_v58  ;;  %v653_v17 = vmul.f32 %v3134_v47, %v3952_v1  ;;  %v2885_v12 = vcombine.high %v4107_v26, %v4109_v55 }
 0x1d3   : > { %v656_v37 = vmul.f32 %v3136_v59, %v3941_v57  ;;  %v602_v0 = vpop.xlane.xlu1 %601  ;;  %v732_v32 = vadd.f32 %v4105_v48, %v692_v25  ;;  %v655_v1 = vmul.f32 %v3136_v59, %v3938_v56  ;;  %v731_v50 = vadd.f32 %v4114_v62, %v691_v61  ;;  %v4139_v59 = vld [vmem:[#allocation10 + $0x150] sm:$0xff] }
 0x1d4   : > { %v694_v42 = vmul.f32 %v4096_v33, %v654_v52  ;;  %v693_v35 = vmul.f32 %v4101_v19, %v653_v17  ;;  %3147 = vrsqrt.f32 %v632_v9  ;;  %v620_v58 = vmul.f32 0.00390625, %v602_v0 }
 0x1d5   : > { %v3138_v43 = vpop.eup %3137  ;;  %v696_v20 = vmul.f32 %v4096_v33, %v656_v37  ;;  %3149 = vrsqrt.f32 %v631_v40  ;;  %v619_v52 = vmul.f32 0.00390625, %v599_v5  ;;  %v695_v9 = vmul.f32 %v4101_v19, %v655_v1  ;;  %v820_v5 = vld [vmem:[#allocation10 + $0x178] sm:$0xff] }
 0x1d6   : > { %v3140_v49 = vpop.eup %3139  ;;  %v734_v57 = vadd.f32 %v4105_v48, %v694_v42  ;;  %v658_v51 = vmul.f32 %v3138_v43, %v3961_v8  ;;  %v733_v47 = vadd.f32 %v4114_v62, %v693_v35  ;;  %v657_v25 = vmul.f32 %v3138_v43, %v3958_v3  ;;  %v4141_v42 = vld [vmem:[#allocation10 + $0x170] sm:$0xff]  ;;  %v4152_v43 = vld [vmem:[#allocation10 + $0x158] sm:$0xff] }
 0x1d7   : > { %v660_v0 = vmul.f32 %v3140_v49, %v3975_v21  ;;  %v736_v3 = vadd.f32 %v4105_v48, %v696_v20  ;;  %v634_v35 = vadd.f32 1e-05, %v620_v58  ;;  %v2884_v21 = vcombine.low %v4107_v26, %v4109_v55 }
 0x1d8   : > { %v4136_v17 = vpack.c.bf16 %v734_v57, %v732_v32  ;;  %v698_v56 = vmul.f32 %v4096_v33, %v658_v51  ;;  %v4143_v8 = vpack.c.bf16 %v733_v47, %v731_v50  ;;  %v697_v37 = vmul.f32 %v4101_v19, %v657_v25  ;;  %v608_v57 = vpop.xlane.xlu1 %607  ;;  %v812_v47 = vld [vmem:[#allocation10 + $0x138] sm:$0xff] }
 0x1d9   : > { %v3142_v61 = vpop.eup %3141  ;;  %v2886_v1 = vcombine.low %v4116_v11, %v4118_v2  ;;  %v2877_v50 = vcombine.high %v4139_v59, %v4141_v42  ;;  %v633_v51 = vadd.f32 1e-05, %v619_v52  ;;  %v2879_v11 = vcombine.high %v4152_v43, %v820_v5 }
 0x1da   : > { %1615 = vmatprep.mubr.bf16.mxu0 %v4136_v17  ;;  %1718 = vmatprep.mubr.bf16.mxu1 %v4136_v17  ;;  %v738_v40 = vadd.f32 %v4105_v48, %v698_v56  ;;  %v662_v32 = vmul.f32 %v3142_v61, %v3981_v27  ;;  %v737_v20 = vadd.f32 %v4114_v62, %v697_v37  ;;  %v622_v58 = vmul.f32 0.00390625, %v608_v57 }
 0x1db   : > { %1616 = vmatmul.mubr.bf16.vlgmr.msra.gmra.mxu0 %v4143_v8  ;;  %1719 = vmatmul.mubr.bf16.vlgmr.msra.gmra.mxu1 %v4143_v8  ;;  %v700_v2 = vmul.f32 %v4096_v33, %v660_v0  ;;  %v661_v16 = vmul.f32 %v3142_v61, %v3978_v23  ;;  %v735_v22 = vadd.f32 %v4114_v62, %v695_v9  ;;  %3151 = vrsqrt.f32 %v634_v35  ;;  %v4187_v9 = vld [vmem:[#allocation10 + $0xd0] sm:$0xff] }
 0x1dc   : > { %1790 = vmatpush1.bf16.msra.mxu0 %v2892_v29  ;;  %1893 = vmatpush1.bf16.msra.mxu1 %v2894_v34  ;;  %v4169_v27 = vpack.c.bf16 %v738_v40, %v736_v3  ;;  %v702_v26 = vmul.f32 %v4096_v33, %v662_v32  ;;  %v605_v29 = vpop.xlane.xlu0 %604  ;;  %v659_v25 = vmul.f32 %v3140_v49, %v3972_v28  ;;  %3153 = vrsqrt.f32 %v633_v51  ;;  %v803_v28 = vld [vmem:[#allocation10 + $0xf0] sm:$0xff]  ;;  %v800_v49 = vld [vmem:[#allocation10 + $0xd8] sm:$0xff] }
 0x1dd   : > { %v3144_v55 = vpop.eup %3143  ;;  %1791 = vmatprep.subr.bf16.mxu0 %v2885_v12  ;;  %1894 = vmatprep.subr.bf16.mxu1 %v2887_v44  ;;  %v811_v12 = vld [vmem:[#allocation10 + $0x130] sm:$0xff]  ;;  %v808_v44 = vld [vmem:[#allocation10 + $0x118] sm:$0xff]  ;;  %v2876_v52 = vcombine.low %v4139_v59, %v4141_v42  ;;  %v2878_v56 = vcombine.low %v4152_v43, %v820_v5  ;;  %v4185_v61 = vpack.c.bf16 %v737_v20, %v735_v22  ;;  %v621_v37 = vmul.f32 0.00390625, %v605_v29 }
 0x1de   : > { %v3146_v24 = vpop.eup %3145  ;;  %1625 = vmatprep.mubr.bf16.mxu0 %v4169_v27  ;;  %1728 = vmatprep.mubr.bf16.mxu1 %v4169_v27  ;;  %v742_v34 = vadd.f32 %v4105_v48, %v702_v26  ;;  %v666_v23 = vmul.f32 %v3144_v55, %v4001_v46  ;;  %v740_v0 = vadd.f32 %v4105_v48, %v700_v2  ;;  %v804_v46 = vld [vmem:[#allocation10 + $0xf8] sm:$0xff]  ;;  %v636_v32 = vadd.f32 1e-05, %v622_v58  ;;  %v795_v22 = vld [vmem:[#allocation10 + $0xb0] sm:$0xff] }
 0x1df   : > { %v701_v3 = vmul.f32 %v4101_v19, %v661_v16  ;;  %v664_v40 = vmul.f32 %v3146_v24, %v3995_v41  ;;  %v2868_v59 = vcombine.low %v807_v6, %v811_v12  ;;  %v2869_v42 = vcombine.high %v807_v6, %v811_v12  ;;  %v791_v16 = vld [vmem:[#allocation10 + $0x90] sm:$0xff]  ;;  %v792_v6 = vld [vmem:[#allocation10 + $0x98] sm:$0xff] }
 0x1e0   : > { %1792 = vmatpush1.bf16.msra.mxu0 %v2884_v21  ;;  %1895 = vmatpush1.bf16.msra.mxu1 %v2886_v1  ;;  %v2871_v43 = vcombine.high %v808_v44, %v812_v47  ;;  %v4194_v5 = vpack.c.bf16 %v742_v34, %v740_v0  ;;  %v699_v35 = vmul.f32 %v4101_v19, %v659_v25  ;;  %v635_v20 = vadd.f32 1e-05, %v621_v37  ;;  %v796_v34 = vld [vmem:[#allocation10 + $0xb8] sm:$0xff] }
 0x1e1   : > { %1793 = vmatprep.subr.bf16.mxu0 %v2877_v50  ;;  %1896 = vmatprep.subr.bf16.mxu1 %v2879_v11  ;;  %v706_v57 = vmul.f32 %v4096_v33, %v666_v23  ;;  %v3148_v21 = vpop.eup %3147  ;;  %v2870_v1 = vcombine.low %v808_v44, %v812_v47  ;;  %v2861_v41 = vcombine.high %v4187_v9, %v803_v28  ;;  %3155 = vrsqrt.f32 %v636_v32 }
 0x1e2   : > { %v2863_v50 = vcombine.high %v800_v49, %v804_v46  ;;  %v3150_v51 = vpop.eup %3149  ;;  %v741_v26 = vadd.f32 %v4114_v62, %v701_v3  ;;  %v704_v11 = vmul.f32 %v4096_v33, %v664_v40  ;;  %v665_v2 = vmul.f32 %v3144_v55, %v3998_v45  ;;  %v4209_v55 = vld [vmem:[#allocation10 + $0x50] sm:$0xff] }
 0x1e3   : > { %1626 = vmatmul.mubr.bf16.gmra.mxu0 %v4185_v61  ;;  %1729 = vmatmul.mubr.bf16.gmra.mxu1 %v4185_v61  ;;  %v739_v29 = vadd.f32 %v4114_v62, %v699_v35  ;;  %v746_v58 = vadd.f32 %v4105_v48, %v706_v57  ;;  %v663_v12 = vmul.f32 %v3146_v24, %v3992_v36  ;;  %3157 = vrsqrt.f32 %v635_v20  ;;  %v784_v36 = vld [vmem:[#allocation10 + $0x58] sm:$0xff]  ;;  %v775_v57 = vld [vmem:[#allocation10 + $0x10] sm:$0xff] }
 0x1e4   : > { %1794 = vmatpush1.bf16.msra.mxu0 %v2876_v52  ;;  %1897 = vmatpush1.bf16.msra.mxu1 %v2878_v56  ;;  %v670_v44 = vmul.f32 %v3148_v21, %v4021_v13  ;;  %v2860_v47 = vcombine.low %v4187_v9, %v803_v28  ;;  %v2862_v45 = vcombine.low %v800_v49, %v804_v46  ;;  %v787_v56 = vld [vmem:[#allocation10 + $0x70] sm:$0xff]  ;;  %v788_v24 = vld [vmem:[#allocation10 + $0x78] sm:$0xff] }
 0x1e5   : > { %1635 = vmatprep.mubr.bf16.mxu0 %v4194_v5  ;;  %1738 = vmatprep.mubr.bf16.mxu1 %v4194_v5  ;;  %v668_v25 = vmul.f32 %v3150_v51, %v4015_v7  ;;  %v4212_v23 = vpack.c.bf16 %v741_v26, %v739_v29  ;;  %v744_v52 = vadd.f32 %v4105_v48, %v704_v11  ;;  %v776_v20 = vld [vmem:[#allocation10 + $0x18] sm:$0xff] }
 0x1e6   : > { %1795 = vmatprep.subr.bf16.mxu0 %v2869_v42  ;;  %1898 = vmatprep.subr.bf16.mxu1 %v2871_v43  ;;  %v705_v13 = vmul.f32 %v4101_v19, %v665_v2  ;;  %v2852_v37 = vcombine.low %v791_v16, %v795_v22  ;;  %v2853_v0 = vcombine.high %v791_v16, %v795_v22  ;;  %v780_v26 = vld [vmem:[#allocation10 + $0x38] sm:$0xff]  ;;  %v895_v22 = vld [vmem:[#allocation10 + $0x3d0] sm:$0xff] }
 0x1e7   : > { %v2855_v9 = vcombine.high %v792_v6, %v796_v34  ;;  %v4218_v7 = vpack.c.bf16 %v746_v58, %v744_v52  ;;  %v703_v28 = vmul.f32 %v4101_v19, %v663_v12  ;;  %v710_v49 = vmul.f32 %v4096_v33, %v670_v44  ;;  %v896_v12 = vld [vmem:[#allocation10 + $0x3d8] sm:$0xff] }
 0x1e8   : > { %1796 = vmatpush1.bf16.msra.mxu0 %v2868_v59  ;;  %1899 = vmatpush1.bf16.msra.mxu1 %v2870_v1  ;;  %v3152_v46 = vpop.eup %3151  ;;  %v2854_v3 = vcombine.low %v792_v6, %v796_v34  ;;  %v2845_v40 = vcombine.high %v4209_v55, %v787_v56  ;;  %v2847_v32 = vcombine.high %v784_v36, %v788_v24  ;;  %v899_v6 = vld [vmem:[#allocation10 + $0x3f0] sm:$0xff]  ;;  %v900_v44 = vld [vmem:[#allocation10 + $0x3f8] sm:$0xff] }
 0x1e9   : > { %1797 = vmatprep.subr.bf16.mxu0 %v2861_v41  ;;  %1900 = vmatprep.subr.bf16.mxu1 %v2863_v50  ;;  %v3154_v59 = vpop.eup %3153  ;;  %v745_v42 = vadd.f32 %v4114_v62, %v705_v13  ;;  %v708_v43 = vmul.f32 %v4096_v33, %v668_v25  ;;  %v669_v35 = vmul.f32 %v3148_v21, %v4018_v10  ;;  %v779_v50 = vld [vmem:[#allocation10 + $0x30] sm:$0xff] }
 0x1ea   : > { %v743_v1 = vadd.f32 %v4114_v62, %v703_v28  ;;  %v750_v41 = vadd.f32 %v4105_v48, %v710_v49  ;;  %v667_v11 = vmul.f32 %v3150_v51, %v4012_v4  ;;  %v674_v2 = vmul.f32 %v3152_v46, %v4041_v39  ;;  %v891_v49 = vld [vmem:[#allocation10 + $0x3b0] sm:$0xff] }
 0x1eb   : > { %1636 = vmatmul.mubr.bf16.gmra.mxu0 %v4212_v23  ;;  %1739 = vmatmul.mubr.bf16.gmra.mxu1 %v4212_v23  ;;  %v2844_v16 = vcombine.low %v4209_v55, %v787_v56  ;;  %v2846_v29 = vcombine.low %v784_v36, %v788_v24  ;;  %v672_v10 = vmul.f32 %v3154_v59, %v4035_v31 }
 0x1ec   : > { %1798 = vmatpush1.bf16.msra.mxu0 %v2860_v47  ;;  %1901 = vmatpush1.bf16.msra.mxu1 %v2862_v45  ;;  %v4234_v21 = vpack.c.bf16 %v745_v42, %v743_v1  ;;  %v748_v58 = vadd.f32 %v4105_v48, %v708_v43  ;;  %v709_v34 = vmul.f32 %v4101_v19, %v669_v35  ;;  %v883_v1 = vld [vmem:[#allocation10 + $0x370] sm:$0xff] }
 0x1ed   : > { %1645 = vmatprep.mubr.bf16.mxu0 %v4218_v7  ;;  %1748 = vmatprep.mubr.bf16.mxu1 %v4218_v7  ;;  %v2836_v4 = vcombine.low %v775_v57, %v779_v50  ;;  %v2837_v51 = vcombine.high %v775_v57, %v779_v50  ;;  %v2839_v39 = vcombine.high %v776_v20, %v780_v26  ;;  %v884_v50 = vld [vmem:[#allocation10 + $0x378] sm:$0xff] }
 0x1ee   : > { %1799 = vmatprep.subr.bf16.mxu0 %v2853_v0  ;;  %1902 = vmatprep.subr.bf16.mxu1 %v2855_v9  ;;  %v3156_v47 = vpop.eup %3155  ;;  %v4240_v31 = vpack.c.bf16 %v750_v41, %v748_v58  ;;  %v707_v45 = vmul.f32 %v4101_v19, %v667_v11  ;;  %v714_v55 = vmul.f32 %v4096_v33, %v674_v2  ;;  %v887_v0 = vld [vmem:[#allocation10 + $0x390] sm:$0xff]  ;;  %v880_v41 = vld [vmem:[#allocation10 + $0x358] sm:$0xff] }
 0x1ef   : > { %v2838_v25 = vcombine.low %v776_v20, %v780_v26  ;;  %v2957_v52 = vcombine.high %v895_v22, %v899_v6  ;;  %v712_v56 = vmul.f32 %v4096_v33, %v672_v10  ;;  %v2959_v36 = vcombine.high %v896_v12, %v900_v44 }
 0x1f0   : > { %1800 = vmatpush1.bf16.msra.mxu0 %v2852_v37  ;;  %1903 = vmatpush1.bf16.msra.mxu1 %v2854_v3  ;;  %v749_v24 = vadd.f32 %v4114_v62, %v709_v34  ;;  %v673_v13 = vmul.f32 %v3152_v46, %v4038_v38  ;;  %v3158_v37 = vpop.eup %3157  ;;  %v747_v9 = vadd.f32 %v4114_v62, %v707_v45  ;;  %v888_v3 = vld [vmem:[#allocation10 + $0x398] sm:$0xff]  ;;  %v879_v46 = vld [vmem:[#allocation10 + $0x350] sm:$0xff] }
 0x1f1   : > { %1801 = vmatprep.subr.bf16.mxu0 %v2845_v40  ;;  %1904 = vmatprep.subr.bf16.mxu1 %v2847_v32  ;;  %v754_v28 = vadd.f32 %v4105_v48, %v714_v55  ;;  %v892_v40 = vld [vmem:[#allocation10 + $0x3b8] sm:$0xff]  ;;  %v671_v32 = vmul.f32 %v3154_v59, %v4032_v30  ;;  %v678_v42 = vmul.f32 %v3156_v47, %v4061_v15  ;;  %v871_v34 = vld [vmem:[#allocation10 + $0x310] sm:$0xff] }
 0x1f2   : > { %v2956_v43 = vcombine.low %v895_v22, %v899_v6  ;;  %v2958_v35 = vcombine.low %v896_v12, %v900_v44  ;;  %v752_v38 = vadd.f32 %v4105_v48, %v712_v56  ;;  %v4254_v57 = vpack.c.bf16 %v749_v24, %v747_v9  ;;  %v872_v12 = vld [vmem:[#allocation10 + $0x318] sm:$0xff]  ;;  %v867_v24 = vld [vmem:[#allocation10 + $0x2f0] sm:$0xff] }
 0x1f3   : > { %1646 = vmatmul.mubr.bf16.gmra.mxu0 %v4234_v21  ;;  %1749 = vmatmul.mubr.bf16.gmra.mxu1 %v4234_v21  ;;  %v713_v20 = vmul.f32 %v4101_v19, %v673_v13  ;;  %v676_v30 = vmul.f32 %v3158_v37, %v4055_v60  ;;  %v2948_v59 = vcombine.low %v887_v0, %v891_v49  ;;  %v876_v44 = vld [vmem:[#allocation10 + $0x338] sm:$0xff] }
 0x1f4   : > { %1802 = vmatpush1.bf16.msra.mxu0 %v2844_v16  ;;  %1905 = vmatpush1.bf16.msra.mxu1 %v2846_v29  ;;  %v2949_v15 = vcombine.high %v887_v0, %v891_v49  ;;  %v2951_v26 = vcombine.high %v888_v3, %v892_v40  ;;  %v4260_v11 = vpack.c.bf16 %v754_v28, %v752_v38  ;;  %v864_v13 = vld [vmem:[#allocation10 + $0x2d8] sm:$0xff] }
 0x1f5   : > { %1655 = vmatprep.mubr.bf16.mxu0 %v4240_v31  ;;  %1758 = vmatprep.mubr.bf16.mxu1 %v4240_v31  ;;  %v711_v2 = vmul.f32 %v4101_v19, %v671_v32  ;;  %v718_v16 = vmul.f32 %v4096_v33, %v678_v42  ;;  %v2950_v29 = vcombine.low %v888_v3, %v892_v40  ;;  %v868_v0 = vld [vmem:[#allocation10 + $0x2f8] sm:$0xff]  ;;  %v855_v40 = vld [vmem:[#allocation10 + $0x290] sm:$0xff] }
 0x1f6   : > { %1803 = vmatprep.subr.bf16.mxu0 %v2837_v51  ;;  %1906 = vmatprep.subr.bf16.mxu1 %v2839_v39  ;;  %v2941_v10 = vcombine.high %v879_v46, %v883_v1  ;;  %v2943_v58 = vcombine.high %v880_v41, %v884_v50  ;;  %v753_v60 = vadd.f32 %v4114_v62, %v713_v20  ;;  %v875_v39 = vld [vmem:[#allocation10 + $0x330] sm:$0xff] }
 0x1f7   : > { %v716_v22 = vmul.f32 %v4096_v33, %v676_v30  ;;  %v677_v6 = vmul.f32 %v3156_v47, %v4058_v14  ;;  %v758_v51 = vadd.f32 %v4105_v48, %v718_v16  ;;  %v675_v45 = vmul.f32 %v3158_v37, %v4052_v54  ;;  %v863_v47 = vld [vmem:[#allocation10 + $0x2d0] sm:$0xff]  ;;  %v848_v30 = vld [vmem:[#allocation10 + $0x258] sm:$0xff] }
 0x1f8   : > { %1804 = vmatpush1.bf16.msra.mxu0 %v2836_v4  ;;  %1907 = vmatpush1.bf16.msra.mxu1 %v2838_v25  ;;  %v751_v4 = vadd.f32 %v4114_v62, %v711_v2  ;;  %v2940_v55 = vcombine.low %v879_v46, %v883_v1  ;;  %v2942_v25 = vcombine.low %v880_v41, %v884_v50  ;;  %v859_v42 = vld [vmem:[#allocation10 + $0x2b0] sm:$0xff] }
 0x1f9   : > { %1805 = vmatprep.subr.bf16.mxu0 %v2957_v52  ;;  %1908 = vmatprep.subr.bf16.mxu1 %v2959_v36  ;;  %v756_v14 = vadd.f32 %v4105_v48, %v716_v22  ;;  %v717_v52 = vmul.f32 %v4101_v19, %v677_v6  ;;  %v2933_v56 = vcombine.high %v871_v34, %v875_v39  ;;  %v847_v1 = vld [vmem:[#allocation10 + $0x250] sm:$0xff] }
 0x1fa   : > { %v4272_v33 = vpack.c.bf16 %v753_v60, %v751_v4  ;;  %v2935_v36 = vcombine.high %v872_v12, %v876_v44  ;;  %v715_v37 = vmul.f32 %v4101_v19, %v675_v45  ;;  %v2932_v9 = vcombine.low %v871_v34, %v875_v39  ;;  %v860_v19 = vld [vmem:[#allocation10 + $0x2b8] sm:$0xff]  ;;  %v851_v20 = vld [vmem:[#allocation10 + $0x270] sm:$0xff] }
 0x1fb   : > { %1656 = vmatmul.mubr.bf16.gmra.mxu0 %v4254_v57  ;;  %1759 = vmatmul.mubr.bf16.gmra.mxu1 %v4254_v57  ;;  %v4278_v54 = vpack.c.bf16 %v758_v51, %v756_v14  ;;  %v2934_v48 = vcombine.low %v872_v12, %v876_v44  ;;  %v2925_v28 = vcombine.high %v863_v47, %v867_v24  ;;  %v839_v16 = vld [vmem:[#allocation10 + $0x210] sm:$0xff] }
 0x1fc   : > { %1806 = vmatpush2.bf16.msra.mxu0 %v2956_v43  ;;  %1909 = vmatpush2.bf16.msra.mxu1 %v2958_v35  ;;  %v2927_v49 = vcombine.high %v864_v13, %v868_v0  ;;  %v757_v3 = vadd.f32 %v4114_v62, %v717_v52  ;;  %v755_v32 = vadd.f32 %v4114_v62, %v715_v37  ;;  %v856_v43 = vld [vmem:[#allocation10 + $0x298] sm:$0xff] }
 0x1fd   : > { %1665 = vmatprep.mubr.bf16.mxu0 %v4260_v11  ;;  %1768 = vmatprep.mubr.bf16.mxu1 %v4260_v11  ;;  %v2924_v35 = vcombine.low %v863_v47, %v867_v24  ;;  %v2926_v38 = vcombine.low %v864_v13, %v868_v0  ;;  %v2917_v41 = vcombine.high %v855_v40, %v859_v42 }
 0x1fe   : > { %1807 = vmatprep.subr.bf16.mxu0 %v2949_v15  ;;  %1910 = vmatprep.subr.bf16.mxu1 %v2951_v26  ;;  %v4285_v46 = vpack.c.bf16 %v757_v3, %v755_v32  ;;  %v2919_v50 = vcombine.high %v856_v43, %v860_v19  ;;  %v2916_v62 = vcombine.low %v855_v40, %v859_v42 }
 0x1ff   : > { %v2918_v15 = vcombine.low %v856_v43, %v860_v19  ;;  %v2909_v26 = vcombine.high %v847_v1, %v851_v20  ;;  %v2908_v60 = vcombine.low %v847_v1, %v851_v20 }
 0x200   : > { %1808 = vmatpush2.bf16.msra.mxu0 %v2948_v59  ;;  %1911 = vmatpush2.bf16.msra.mxu1 %v2950_v29  ;;  %v852_v59 = vld [vmem:[#allocation10 + $0x278] sm:$0xff]  ;;  %v843_v29 = vld [vmem:[#allocation10 + $0x230] sm:$0xff] }
 0x201   : > { %1809 = vmatprep.subr.bf16.mxu0 %v2941_v10  ;;  %1912 = vmatprep.subr.bf16.mxu1 %v2943_v58  ;;  %v2911_v2 = vcombine.high %v848_v30, %v852_v59  ;;  %v840_v10 = vld [vmem:[#allocation10 + $0x218] sm:$0xff]  ;;  %v2910_v22 = vcombine.low %v848_v30, %v852_v59  ;;  %v2901_v6 = vcombine.high %v839_v16, %v843_v29 }
 0x202   : > { %v844_v58 = vld [vmem:[#allocation10 + $0x238] sm:$0xff]  ;;  %v2900_v4 = vcombine.low %v839_v16, %v843_v29 }
 0x203   : > { %1666 = vmatmul.mubr.bf16.gmra.mxu0 %v4272_v33  ;;  %1769 = vmatmul.mubr.bf16.gmra.mxu1 %v4272_v33  ;;  %v2903_v34 = vcombine.high %v840_v10, %v844_v58 }
 0x204   : > { %1810 = vmatpush2.bf16.msra.mxu0 %v2940_v55  ;;  %1913 = vmatpush2.bf16.msra.mxu1 %v2942_v25 }
 0x205   : > { %1675 = vmatprep.mubr.bf16.mxu0 %v4278_v54  ;;  %1778 = vmatprep.mubr.bf16.mxu1 %v4278_v54 }
 0x206   : > { %1811 = vmatprep.subr.bf16.mxu0 %v2933_v56  ;;  %1914 = vmatprep.subr.bf16.mxu1 %v2935_v36 }
 0x208   : > { %1812 = vmatpush2.bf16.msra.mxu0 %v2932_v9  ;;  %1915 = vmatpush2.bf16.msra.mxu1 %v2934_v48 }
 0x209   : > { %1813 = vmatprep.subr.bf16.mxu0 %v2925_v28  ;;  %1916 = vmatprep.subr.bf16.mxu1 %v2927_v49 }
 0x20b   : > { %1676 = vmatmul.mubr.bf16.gmra.mxu0 %v4285_v46  ;;  %1779 = vmatmul.mubr.bf16.gmra.mxu1 %v4285_v46 }
 0x20c   : > { %1814 = vmatpush2.bf16.msra.mxu0 %v2924_v35  ;;  %1917 = vmatpush2.bf16.msra.mxu1 %v2926_v38 }
 0x20d   : > { %1821 = vmatprep.mubr.bf16.mxu0 %v4136_v17  ;;  %1924 = vmatprep.mubr.bf16.mxu1 %v4136_v17  ;;  %v2902_v17 = vcombine.low %v840_v10, %v844_v58 }
 0x20e   : > { %1815 = vmatprep.subr.bf16.mxu0 %v2917_v41  ;;  %1918 = vmatprep.subr.bf16.mxu1 %v2919_v50 }
 0x210   : > { %1816 = vmatpush2.bf16.msra.mxu0 %v2916_v62  ;;  %1919 = vmatpush2.bf16.msra.mxu1 %v2918_v15 }
 0x211   : > { %1817 = vmatprep.subr.bf16.mxu0 %v2909_v26  ;;  %1920 = vmatprep.subr.bf16.mxu1 %v2911_v2 }
 0x214   : > { %1818 = vmatpush2.bf16.msra.mxu0 %v2908_v60  ;;  %1921 = vmatpush2.bf16.msra.mxu1 %v2910_v22 }
 0x215   : > { %1819 = vmatprep.subr.bf16.mxu0 %v2901_v6  ;;  %1922 = vmatprep.subr.bf16.mxu1 %v2903_v34 }
 0x218   : > { %1820 = vmatpush2.bf16.msra.mxu0 %v2900_v4  ;;  %1923 = vmatpush2.bf16.msra.mxu1 %v2902_v17 }
 0x21b   : > { %1822 = vmatmul.mubr.bf16.vlgmr.msra.gmra.mxu0 %v4143_v8  ;;  %1925 = vmatmul.mubr.bf16.vlgmr.msra.gmra.mxu1 %v4143_v8  ;;  %v913_v8 = vsub.s32 2, %v4087_v53 }
 0x21c   : > { %1831 = vmatprep.mubr.bf16.mxu0 %v4169_v27  ;;  %1934 = vmatprep.mubr.bf16.mxu1 %v4169_v27  ;;  %v4318_v27 = vld [vmem:[#allocation11] sm:$0xff] }
 0x223   : > { %1832 = vmatmul.mubr.bf16.gmra.mxu0 %v4185_v61  ;;  %1935 = vmatmul.mubr.bf16.gmra.mxu1 %v4185_v61 }
 0x224   : > { %1841 = vmatprep.mubr.bf16.mxu0 %v4194_v5  ;;  %1944 = vmatprep.mubr.bf16.mxu1 %v4194_v5 }
 0x22b   : > { %1842 = vmatmul.mubr.bf16.gmra.mxu0 %v4212_v23  ;;  %1945 = vmatmul.mubr.bf16.gmra.mxu1 %v4212_v23  ;;  %v917_v23 = vsub.s32 3, %v4087_v53 }
 0x22c   : > { %1851 = vmatprep.mubr.bf16.mxu0 %v4218_v7  ;;  %1954 = vmatprep.mubr.bf16.mxu1 %v4218_v7  ;;  %v4323_v7 = vrot.slane %v4318_v27, %v4093_v63 }
 0x22d   : > { %v4333_v51 = vrot.slane %v4318_v27, %v917_v23 }
 0x233   : > { %1852 = vmatmul.mubr.bf16.gmra.mxu0 %v4234_v21  ;;  %1955 = vmatmul.mubr.bf16.gmra.mxu1 %v4234_v21  ;;  %v4326_v21 = vrot.slane %v4318_v27, %v913_v8 }
 0x234   : > { %1861 = vmatprep.mubr.bf16.mxu0 %v4240_v31  ;;  %1964 = vmatprep.mubr.bf16.mxu1 %v4240_v31  ;;  %v4330_v31 = vrot.slane %v4318_v27, %v4090_v18 }
 0x23b   : > { %1862 = vmatmul.mubr.bf16.gmra.mxu0 %v4254_v57  ;;  %1965 = vmatmul.mubr.bf16.gmra.mxu1 %v4254_v57 }
 0x23c   : > { %1871 = vmatprep.mubr.bf16.mxu0 %v4260_v11  ;;  %1974 = vmatprep.mubr.bf16.mxu1 %v4260_v11 }
 0x243   : > { %1872 = vmatmul.mubr.bf16.gmra.mxu0 %v4272_v33  ;;  %1975 = vmatmul.mubr.bf16.gmra.mxu1 %v4272_v33 }
 0x244   : > { %1881 = vmatprep.mubr.bf16.mxu0 %v4278_v54  ;;  %1984 = vmatprep.mubr.bf16.mxu1 %v4278_v54 }
 0x24b   : > { %1882 = vmatmul.mubr.bf16.gmra.mxu0 %v4285_v46  ;;  %1985 = vmatmul.mubr.bf16.gmra.mxu1 %v4285_v46 }
 0x29b   : > { %v1617_v61 = vpop.f32.mrf.mxu0  ;;  %v1720_v5 = vpop.f32.mrf.mxu1 }
 0x29c   : > { %v1618_v44 = vadd.f32 %v1617_v61, %v4323_v7  ;;  %v1721_v45 = vadd.f32 %v1720_v5, %v4326_v21 }
 0x29d   : > { %v1619_v57 = vpop.f32.mrf.mxu0  ;;  %v1722_v11 = vpop.f32.mrf.mxu1 }
 0x29e   : > { %v1620_v25 = vadd.f32 %v1619_v57, %v4330_v31  ;;  %v1723_v36 = vadd.f32 %v1722_v11, %v4333_v51  ;;  %v921_v11 = vsub.s32 4, %v4087_v53 }
 0x29f   : > { %v1621_v39 = vpop.f32.mrf.mxu0  ;;  %v1724_v12 = vpop.f32.mrf.mxu1 }
 0x2a0   : > { %v1622_v63 = vadd.f32 %v1621_v39, %v4323_v7  ;;  %v1725_v55 = vadd.f32 %v1724_v12, %v4326_v21 }
 0x2a1   : > { %v1623_v33 = vpop.f32.mrf.mxu0  ;;  %v1726_v18 = vpop.f32.mrf.mxu1 }
 0x2a2   : > { %v4340_v14 = vpack.c.bf16 %v1622_v63, %v1618_v44  ;;  %v4342_v47 = vpack.c.bf16 %v1725_v55, %v1721_v45  ;;  %v1624_v52 = vadd.f32 %v1623_v33, %v4330_v31  ;;  %v1727_v56 = vadd.f32 %v1726_v18, %v4333_v51 }
 0x2a3   : > { %v1627_v24 = vpop.f32.mrf.mxu0  ;;  %v1730_v13 = vpop.f32.mrf.mxu1  ;;  %v929_v18 = vsub.s32 6, %v4087_v53 }
 0x2a4   : > { %v2107_v0 = vmul.bf16 1060454197, %v4340_v14  ;;  %v4348_v54 = vpack.c.bf16 %v1624_v52, %v1620_v25  ;;  %v2109_v37 = vmul.bf16 1060454197, %v4342_v47  ;;  %v4351_v9 = vpack.c.bf16 %v1727_v56, %v1723_v36 }
 0x2a5   : > { %v1629_v48 = vpop.f32.mrf.mxu0  ;;  %v1732_v28 = vpop.f32.mrf.mxu1  ;;  %v1628_v40 = vadd.f32 %v1627_v24, %v4323_v7  ;;  %v1731_v43 = vadd.f32 %v1730_v13, %v4326_v21  ;;  %v2051_v63 = vmul.bf16 1056980736, %v4340_v14  ;;  %v925_v52 = vsub.s32 5, %v4087_v53 }
 0x2a6   : > { %3159 = verf.bf16 %v2107_v0  ;;  %v2108_v49 = vmul.bf16 1060454197, %v4348_v54  ;;  %v2110_v3 = vmul.bf16 1060454197, %v4351_v9  ;;  %v1630_v38 = vadd.f32 %v1629_v48, %v4330_v31 }
 0x2a7   : > { %3161 = verf.bf16 %v2109_v37  ;;  %v1631_v32 = vpop.f32.mrf.mxu0  ;;  %v1734_v42 = vpop.f32.mrf.mxu1  ;;  %v1733_v59 = vadd.f32 %v1732_v28, %v4333_v51  ;;  %v2053_v36 = vmul.bf16 1056980736, %v4342_v47  ;;  %v2052_v24 = vmul.bf16 1056980736, %v4348_v54 }
 0x2a8   : > { %3163 = verf.bf16 %v2108_v49  ;;  %v1632_v19 = vadd.f32 %v1631_v32, %v4323_v7  ;;  %v1735_v35 = vadd.f32 %v1734_v42, %v4326_v21  ;;  %v2054_v48 = vmul.bf16 1056980736, %v4351_v9 }
 0x2a9   : > { %3165 = verf.bf16 %v2110_v3  ;;  %v1633_v46 = vpop.f32.mrf.mxu0  ;;  %v1736_v1 = vpop.f32.mrf.mxu1 }
 0x2aa   : > { %v4360_v41 = vpack.c.bf16 %v1632_v19, %v1628_v40  ;;  %v4362_v50 = vpack.c.bf16 %v1735_v35, %v1731_v43  ;;  %v1634_v20 = vadd.f32 %v1633_v46, %v4330_v31  ;;  %v1737_v30 = vadd.f32 %v1736_v1, %v4333_v51 }
 0x2ab   : > { %v1637_v62 = vpop.f32.mrf.mxu0  ;;  %v1740_v15 = vpop.f32.mrf.mxu1 }
 0x2ac   : > { %v2115_v26 = vmul.bf16 1060454197, %v4360_v41  ;;  %v4368_v2 = vpack.c.bf16 %v1634_v20, %v1630_v38  ;;  %v2117_v16 = vmul.bf16 1060454197, %v4362_v50  ;;  %v4371_v29 = vpack.c.bf16 %v1737_v30, %v1733_v59 }
 0x2ad   : > { %v1639_v10 = vpop.f32.mrf.mxu0  ;;  %v1742_v58 = vpop.f32.mrf.mxu1  ;;  %v1638_v6 = vadd.f32 %v1637_v62, %v4323_v7  ;;  %v1741_v17 = vadd.f32 %v1740_v15, %v4326_v21  ;;  %v2059_v47 = vmul.bf16 1056980736, %v4360_v41 }
 0x2ae   : > { %3167 = verf.bf16 %v2115_v26  ;;  %v2116_v60 = vmul.bf16 1060454197, %v4368_v2  ;;  %v2118_v22 = vmul.bf16 1060454197, %v4371_v29  ;;  %v1640_v5 = vadd.f32 %v1639_v10, %v4330_v31 }
 0x2af   : > { %3169 = verf.bf16 %v2117_v16  ;;  %v1641_v34 = vpop.f32.mrf.mxu0  ;;  %v1744_v4 = vpop.f32.mrf.mxu1  ;;  %v1743_v55 = vadd.f32 %v1742_v58, %v4333_v51 }
 0x2b0   : > { %3171 = verf.bf16 %v2116_v60  ;;  %v1642_v8 = vadd.f32 %v1641_v34, %v4323_v7  ;;  %v1745_v61 = vadd.f32 %v1744_v4, %v4326_v21 }
 0x2b1   : > { %3173 = verf.bf16 %v2118_v22  ;;  %v1643_v23 = vpop.f32.mrf.mxu0  ;;  %v1746_v57 = vpop.f32.mrf.mxu1 }
 0x2b2   : > { %v4381_v39 = vpack.c.bf16 %v1642_v8, %v1638_v6  ;;  %v4383_v12 = vpack.c.bf16 %v1745_v61, %v1741_v17  ;;  %v1644_v44 = vadd.f32 %v1643_v23, %v4330_v31  ;;  %v1747_v45 = vadd.f32 %v1746_v57, %v4333_v51 }
 0x2b3   : > { %v1647_v25 = vpop.f32.mrf.mxu0  ;;  %v1750_v33 = vpop.f32.mrf.mxu1 }
 0x2b4   : > { %v3160_v56 = vpop.eup %3159  ;;  %v2123_v13 = vmul.bf16 1060454197, %v4381_v39  ;;  %v4395_v0 = vpack.c.bf16 %v1644_v44, %v1640_v5  ;;  %v2125_v28 = vmul.bf16 1060454197, %v4383_v12  ;;  %v4399_v49 = vpack.c.bf16 %v1747_v45, %v1743_v55 }
 0x2b5   : > { %v3162_v37 = vpop.eup %3161  ;;  %v2219_v14 = vadd.bf16 1065369472, %v3160_v56  ;;  %v1649_v3 = vpop.f32.mrf.mxu0  ;;  %v1648_v38 = vadd.f32 %v1647_v25, %v4323_v7  ;;  %v1751_v62 = vadd.f32 %v1750_v33, %v4326_v21  ;;  %v2061_v55 = vmul.bf16 1056980736, %v4362_v50 }
 0x2b6   : > { %v1752_v40 = vpop.f32.mrf.mxu1  ;;  %v3164_v32 = vpop.eup %3163  ;;  %v2221_v42 = vadd.bf16 1065369472, %v3162_v37  ;;  %3175 = verf.bf16 %v2123_v13  ;;  %v2124_v54 = vmul.bf16 1060454197, %v4395_v0  ;;  %v2126_v30 = vmul.bf16 1060454197, %v4399_v49 }
 0x2b7   : > { %v3166_v43 = vpop.eup %3165  ;;  %v2275_v19 = vmul.bf16 %v2219_v14, %v2051_v63  ;;  %v2220_v35 = vadd.bf16 1065369472, %v3164_v32  ;;  %3177 = verf.bf16 %v2125_v28  ;;  %v1651_v9 = vpop.f32.mrf.mxu0  ;;  %v1650_v41 = vadd.f32 %v1649_v3, %v4330_v31 }
 0x2b8   : > { %v1754_v46 = vpop.f32.mrf.mxu1  ;;  %v2277_v1 = vmul.bf16 %v2221_v42, %v2053_v36  ;;  %v2222_v20 = vadd.bf16 1065369472, %v3166_v43  ;;  %3179 = verf.bf16 %v2124_v54  ;;  %v1753_v15 = vadd.f32 %v1752_v40, %v4333_v51 }
 0x2b9   : > { %v2276_v59 = vmul.bf16 %v2220_v35, %v2052_v24  ;;  %v1653_v26 = vpop.f32.mrf.mxu0  ;;  %3181 = verf.bf16 %v2126_v30  ;;  %v1652_v58 = vadd.f32 %v1651_v9, %v4323_v7  ;;  %v1755_v60 = vadd.f32 %v1754_v46, %v4326_v21 }
 0x2ba   : > { %v1756_v16 = vpop.f32.mrf.mxu1  ;;  %v2278_v10 = vmul.bf16 %v2222_v20, %v2054_v48  ;;  %v1654_v34 = vadd.f32 %v1653_v26, %v4330_v31  ;;  %v2060_v25 = vmul.bf16 1056980736, %v4368_v2  ;;  %v2062_v37 = vmul.bf16 1056980736, %v4371_v29 }
 0x2bb   : > { %v2960_v22 = vcombine.low %v2275_v19, %v2276_v59  ;;  %v2964_v6 = vcombine.high %v2275_v19, %v2276_v59  ;;  %v1757_v4 = vadd.f32 %v1756_v16, %v4333_v51  ;;  %v1657_v17 = vpop.f32.mrf.mxu0  ;;  %v4412_v57 = vpack.c.bf16 %v1652_v58, %v1648_v38 }
 0x2bc   : > { %v1760_v8 = vpop.f32.mrf.mxu1  ;;  %v3168_v61 = vpop.eup %3167  ;;  %v2961_v5 = vcombine.low %v2277_v1, %v2278_v10  ;;  %v2965_v23 = vcombine.high %v2277_v1, %v2278_v10  ;;  %v4414_v44 = vpack.c.bf16 %v1755_v60, %v1751_v62  ;;  %v4424_v33 = vpack.c.bf16 %v1654_v34, %v1650_v41 }
 0x2bd   : > { %v3170_v45 = vpop.eup %3169  ;;  %2611 = vst [vmem:[%s4418_s2] sm:$0xff] %v2960_v22  ;;  %2615 = vst [vmem:[%s4418_s2 + $0x20] sm:$0xff] %v2964_v6  ;;  %v2227_v63 = vadd.bf16 1065369472, %v3168_v61  ;;  %v1659_v56 = vpop.f32.mrf.mxu0  ;;  %v2131_v14 = vmul.bf16 1060454197, %v4412_v57  ;;  %v4430_v48 = vpack.c.bf16 %v1757_v4, %v1753_v15  ;;  %v1658_v43 = vadd.f32 %v1657_v17, %v4323_v7 }
 0x2be   : > { %v1762_v36 = vpop.f32.mrf.mxu1  ;;  %v3172_v24 = vpop.eup %3171  ;;  %2612 = vst [vmem:[%s4418_s2 + $0x8] sm:$0xff] %v2961_v5  ;;  %2616 = vst [vmem:[%s4418_s2 + $0x28] sm:$0xff] %v2965_v23  ;;  %v2229_v13 = vadd.bf16 1065369472, %v3170_v45  ;;  %v2067_v50 = vmul.bf16 1056980736, %v4381_v39  ;;  %v1761_v20 = vadd.f32 %v1760_v8, %v4326_v21  ;;  %v1660_v5 = vadd.f32 %v1659_v56, %v4330_v31 }
 0x2bf   : > { %v3174_v28 = vpop.eup %3173  ;;  %v2228_v3 = vadd.bf16 1065369472, %v3172_v24  ;;  %v2133_v2 = vmul.bf16 1060454197, %v4414_v44  ;;  %v1661_v40 = vpop.f32.mrf.mxu0  ;;  %v2069_v54 = vmul.bf16 1056980736, %v4383_v12  ;;  %3183 = verf.bf16 %v2131_v14 }
 0x2c0   : > { %v1764_v32 = vpop.f32.mrf.mxu1  ;;  %v2230_v42 = vadd.bf16 1065369472, %v3174_v28  ;;  %v2283_v19 = vmul.bf16 %v2227_v63, %v2059_v47  ;;  %v2132_v35 = vmul.bf16 1060454197, %v4424_v33  ;;  %v2285_v46 = vmul.bf16 %v2229_v13, %v2061_v55 }
 0x2c1   : > { %v2284_v29 = vmul.bf16 %v2228_v3, %v2060_v25  ;;  %3185 = verf.bf16 %v2133_v2  ;;  %v1663_v38 = vpop.f32.mrf.mxu0  ;;  %v2134_v1 = vmul.bf16 1060454197, %v4430_v48  ;;  %v1662_v59 = vadd.f32 %v1661_v40, %v4323_v7 }
 0x2c2   : > { %v1766_v9 = vpop.f32.mrf.mxu1  ;;  %v2286_v39 = vmul.bf16 %v2230_v42, %v2062_v37  ;;  %3187 = verf.bf16 %v2132_v35  ;;  %v1765_v16 = vadd.f32 %v1764_v32, %v4326_v21  ;;  %v1664_v22 = vadd.f32 %v1663_v38, %v4330_v31 }
 0x2c3   : > { %v2968_v30 = vcombine.low %v2283_v19, %v2284_v29  ;;  %v2972_v12 = vcombine.high %v2283_v19, %v2284_v29  ;;  %v1667_v47 = vpop.f32.mrf.mxu0  ;;  %3189 = verf.bf16 %v2134_v1  ;;  %v4443_v60 = vpack.c.bf16 %v1662_v59, %v1658_v43 }
 0x2c4   : > { %v1770_v62 = vpop.f32.mrf.mxu1  ;;  %v3176_v41 = vpop.eup %3175  ;;  %v2969_v15 = vcombine.low %v2285_v46, %v2286_v39  ;;  %v2973_v26 = vcombine.high %v2285_v46, %v2286_v39  ;;  %v1767_v6 = vadd.f32 %v1766_v9, %v4333_v51  ;;  %v2068_v8 = vmul.bf16 1056980736, %v4395_v0 }
 0x2c5   : > { %v3178_v10 = vpop.eup %3177  ;;  %2619 = vst [vmem:[%s4418_s2 + $0x40] sm:$0xff] %v2968_v30  ;;  %2623 = vst [vmem:[%s4418_s2 + $0x60] sm:$0xff] %v2972_v12  ;;  %v2235_v58 = vadd.bf16 1065369472, %v3176_v41  ;;  %v1669_v34 = vpop.f32.mrf.mxu0  ;;  %v2070_v61 = vmul.bf16 1056980736, %v4399_v49  ;;  %v4452_v23 = vpack.c.bf16 %v1765_v16, %v1761_v20  ;;  %v1763_v55 = vadd.f32 %v1762_v36, %v4333_v51 }
 0x2c6   : > { %v1772_v4 = vpop.f32.mrf.mxu1  ;;  %v3180_v17 = vpop.eup %3179  ;;  %2620 = vst [vmem:[%s4418_s2 + $0x48] sm:$0xff] %v2969_v15  ;;  %2624 = vst [vmem:[%s4418_s2 + $0x68] sm:$0xff] %v2973_v26  ;;  %v2237_v45 = vadd.bf16 1065369472, %v3178_v10  ;;  %v2139_v25 = vmul.bf16 1060454197, %v4443_v60  ;;  %v4458_v3 = vpack.c.bf16 %v1664_v22, %v1660_v5  ;;  %v1670_v46 = vadd.f32 %v1669_v34, %v4330_v31 }
 0x2c7   : > { %v2236_v63 = vadd.bf16 1065369472, %v3180_v17  ;;  %v1671_v24 = vpop.f32.mrf.mxu0  ;;  %v3182_v37 = vpop.eup %3181  ;;  %v2291_v14 = vmul.bf16 %v2235_v58, %v2067_v50  ;;  %v2075_v28 = vmul.bf16 1056980736, %v4412_v57  ;;  %v2141_v0 = vmul.bf16 1060454197, %v4452_v23 }
 0x2c8   : > { %v1774_v13 = vpop.f32.mrf.mxu1  ;;  %v2238_v56 = vadd.bf16 1065369472, %v3182_v37  ;;  %3191 = verf.bf16 %v2139_v25  ;;  %v4460_v2 = vpack.c.bf16 %v1767_v6, %v1763_v55  ;;  %v2140_v32 = vmul.bf16 1060454197, %v4458_v3 }
 0x2c9   : > { %v2292_v49 = vmul.bf16 %v2236_v63, %v2068_v8  ;;  %v1673_v40 = vpop.f32.mrf.mxu0  ;;  %3193 = verf.bf16 %v2141_v0  ;;  %v1668_v50 = vadd.f32 %v1667_v47, %v4323_v7  ;;  %v1771_v57 = vadd.f32 %v1770_v62, %v4326_v21 }
 0x2ca   : > { %v1776_v36 = vpop.f32.mrf.mxu1  ;;  %v2293_v42 = vmul.bf16 %v2237_v45, %v2069_v54  ;;  %v2294_v29 = vmul.bf16 %v2238_v56, %v2070_v61  ;;  %3195 = verf.bf16 %v2140_v32  ;;  %v2142_v9 = vmul.bf16 1060454197, %v4460_v2 }
 0x2cb   : > { %v2976_v43 = vcombine.low %v2291_v14, %v2292_v49  ;;  %v2980_v19 = vcombine.high %v2291_v14, %v2292_v49  ;;  %v1677_v35 = vpop.f32.mrf.mxu0  ;;  %v1672_v39 = vadd.f32 %v1671_v24, %v4323_v7  ;;  %v1775_v54 = vadd.f32 %v1774_v13, %v4326_v21 }
 0x2cc   : > { %v1780_v38 = vpop.f32.mrf.mxu1  ;;  %v2977_v1 = vcombine.low %v2293_v42, %v2294_v29  ;;  %v2981_v20 = vcombine.high %v2293_v42, %v2294_v29  ;;  %v1674_v30 = vadd.f32 %v1673_v40, %v4330_v31  ;;  %3197 = verf.bf16 %v2142_v9 }
 0x2cd   : > { %2627 = vst [vmem:[%s4418_s2 + $0x80] sm:$0xff] %v2976_v43  ;;  %2631 = vst [vmem:[%s4418_s2 + $0xa0] sm:$0xff] %v2980_v19  ;;  %v1679_v12 = vpop.f32.mrf.mxu0  ;;  %v3184_v47 = vpop.eup %3183  ;;  %v1773_v62 = vadd.f32 %v1772_v4, %v4333_v51  ;;  %v4473_v41 = vpack.c.bf16 %v1672_v39, %v1668_v50  ;;  %v1777_v15 = vadd.f32 %v1776_v36, %v4333_v51  ;;  %v2077_v10 = vmul.bf16 1056980736, %v4414_v44 }
 0x2ce   : > { %v1782_v59 = vpop.f32.mrf.mxu1  ;;  %2628 = vst [vmem:[%s4418_s2 + $0x88] sm:$0xff] %v2977_v1  ;;  %2632 = vst [vmem:[%s4418_s2 + $0xa8] sm:$0xff] %v2981_v20  ;;  %v2243_v16 = vadd.bf16 1065369472, %v3184_v47  ;;  %v4479_v58 = vpack.c.bf16 %v1775_v54, %v1771_v57  ;;  %v4481_v22 = vpack.c.bf16 %v1674_v30, %v1670_v46  ;;  %v2076_v8 = vmul.bf16 1056980736, %v4424_v33 }
 0x2cf   : > { %v3186_v26 = vpop.eup %3185  ;;  %v1681_v6 = vpop.f32.mrf.mxu0  ;;  %v2147_v4 = vmul.bf16 1060454197, %v4473_v41  ;;  %v4485_v61 = vpack.c.bf16 %v1777_v15, %v1773_v62  ;;  %v2078_v45 = vmul.bf16 1056980736, %v4430_v48  ;;  %v1678_v44 = vadd.f32 %v1677_v35, %v4323_v7 }
 0x2d0   : > { %v1784_v34 = vpop.f32.mrf.mxu1  ;;  %v2245_v17 = vadd.bf16 1065369472, %v3186_v26  ;;  %v3188_v5 = vpop.eup %3187  ;;  %v2149_v63 = vmul.bf16 1060454197, %v4479_v58  ;;  %v1781_v55 = vadd.f32 %v1780_v38, %v4326_v21  ;;  %v2299_v24 = vmul.bf16 %v2243_v16, %v2075_v28 }
 0x2d1   : > { %v3190_v25 = vpop.eup %3189  ;;  %v2244_v13 = vadd.bf16 1065369472, %v3188_v5  ;;  %3199 = verf.bf16 %v2147_v4  ;;  %v2148_v37 = vmul.bf16 1060454197, %v4481_v22  ;;  %v2150_v0 = vmul.bf16 1060454197, %v4485_v61  ;;  %v1683_v49 = vpop.f32.mrf.mxu0 }
 0x2d2   : > { %v2301_v33 = vmul.bf16 %v2245_v17, %v2077_v10  ;;  %v2246_v14 = vadd.bf16 1065369472, %v3190_v25  ;;  %3201 = verf.bf16 %v2149_v63  ;;  %v1786_v56 = vpop.f32.mrf.mxu1  ;;  %v1680_v40 = vadd.f32 %v1679_v12, %v4330_v31 }
 0x2d3   : > { %v2300_v48 = vmul.bf16 %v2244_v13, %v2076_v8  ;;  %3203 = verf.bf16 %v2148_v37  ;;  %v1783_v36 = vadd.f32 %v1782_v59, %v4333_v51  ;;  %v1682_v32 = vadd.f32 %v1681_v6, %v4323_v7 }
 0x2d4   : > { %v2302_v28 = vmul.bf16 %v2246_v14, %v2078_v45  ;;  %3205 = verf.bf16 %v2150_v0  ;;  %v1785_v50 = vadd.f32 %v1784_v34, %v4326_v21  ;;  %v1684_v43 = vadd.f32 %v1683_v49, %v4330_v31 }
 0x2d5   : > { %v2984_v57 = vcombine.low %v2299_v24, %v2300_v48  ;;  %v2988_v42 = vcombine.high %v2299_v24, %v2300_v48  ;;  %v1787_v19 = vadd.f32 %v1786_v56, %v4333_v51  ;;  %v4499_v9 = vpack.c.bf16 %v1682_v32, %v1678_v44 }
 0x2d6   : > { %v3192_v29 = vpop.eup %3191  ;;  %v2985_v35 = vcombine.low %v2301_v33, %v2302_v28  ;;  %v2989_v38 = vcombine.high %v2301_v33, %v2302_v28  ;;  %v4501_v46 = vpack.c.bf16 %v1785_v50, %v1781_v55  ;;  %v4505_v7 = vpack.c.bf16 %v1684_v43, %v1680_v40 }
 0x2d7   : > { %v3194_v39 = vpop.eup %3193  ;;  %2635 = vst [vmem:[%s4418_s2 + $0xc0] sm:$0xff] %v2984_v57  ;;  %2639 = vst [vmem:[%s4418_s2 + $0xe0] sm:$0xff] %v2988_v42  ;;  %v4507_v21 = vpack.c.bf16 %v1787_v19, %v1783_v36  ;;  %v4512_v31 = vrot.slane %v4318_v27, %v921_v11  ;;  %v2251_v51 = vadd.bf16 1065369472, %v3192_v29  ;;  %v2155_v1 = vmul.bf16 1060454197, %v4499_v9 }
 0x2d8   : > { %2636 = vst [vmem:[%s4418_s2 + $0xc8] sm:$0xff] %v2985_v35  ;;  %2640 = vst [vmem:[%s4418_s2 + $0xe8] sm:$0xff] %v2989_v38  ;;  %v4520_v20 = vrot.slane %v4318_v27, %v929_v18  ;;  %v933_v54 = vsub.s32 7, %v4087_v53  ;;  %v3196_v30 = vpop.eup %3195  ;;  %v2083_v12 = vmul.bf16 1056980736, %v4443_v60  ;;  %v4529_v47 = vrot.slane %v4318_v27, %v925_v52 }
 0x2d9   : > { %v2084_v59 = vmul.bf16 1056980736, %v4458_v3  ;;  %v2157_v11 = vmul.bf16 1060454197, %v4501_v46  ;;  %v2253_v62 = vadd.bf16 1065369472, %v3194_v39  ;;  %3207 = verf.bf16 %v2155_v1 }
 0x2da   : > { %v2252_v15 = vadd.bf16 1065369472, %v3196_v30  ;;  %v2156_v18 = vmul.bf16 1060454197, %v4505_v7  ;;  %v3198_v10 = vpop.eup %3197  ;;  %v2085_v6 = vmul.bf16 1056980736, %v4452_v23  ;;  %v2307_v34 = vmul.bf16 %v2251_v51, %v2083_v12 }
 0x2db   : > { %v1823_v26 = vpop.f32.mrf.mxu0  ;;  %v1926_v16 = vpop.f32.mrf.mxu1  ;;  %v2086_v60 = vmul.bf16 1056980736, %v4460_v2  ;;  %3209 = verf.bf16 %v2157_v11  ;;  %v2158_v3 = vmul.bf16 1060454197, %v4507_v21  ;;  %v2254_v17 = vadd.bf16 1065369472, %v3198_v10 }
 0x2dc   : > { %v2308_v53 = vmul.bf16 %v2252_v15, %v2084_v59  ;;  %3211 = verf.bf16 %v2156_v18  ;;  %v2091_v4 = vmul.bf16 1056980736, %v4473_v41  ;;  %v2093_v5 = vmul.bf16 1056980736, %v4479_v58 }
 0x2dd   : > { %v1825_v52 = vpop.f32.mrf.mxu0  ;;  %v1928_v8 = vpop.f32.mrf.mxu1  ;;  %3213 = verf.bf16 %v2158_v3  ;;  %v4538_v23 = vrot.slane %v4318_v27, %v933_v54  ;;  %v2309_v2 = vmul.bf16 %v2253_v62, %v2085_v6  ;;  %v2310_v44 = vmul.bf16 %v2254_v17, %v2086_v60 }
 0x2de   : > { %v2992_v45 = vcombine.low %v2307_v34, %v2308_v53  ;;  %v2996_v63 = vcombine.high %v2307_v34, %v2308_v53  ;;  %v1824_v13 = vadd.f32 %v1823_v26, %v4512_v31  ;;  %v1927_v37 = vadd.f32 %v1926_v16, %v4520_v20 }
 0x2df   : > { %v1827_v55 = vpop.f32.mrf.mxu0  ;;  %v1930_v25 = vpop.f32.mrf.mxu1  ;;  %v2993_v27 = vcombine.low %v2309_v2, %v2310_v44  ;;  %v2997_v14 = vcombine.high %v2309_v2, %v2310_v44  ;;  %v2092_v49 = vmul.bf16 1056980736, %v4481_v22  ;;  %v2094_v43 = vmul.bf16 1056980736, %v4485_v61 }
 0x2e0   : > { %v3200_v24 = vpop.eup %3199  ;;  %v1828_v41 = vadd.f32 %v1827_v55, %v4512_v31  ;;  %v1931_v58 = vadd.f32 %v1930_v25, %v4520_v20  ;;  %2643 = vst [vmem:[%s4418_s2 + $0x100] sm:$0xff] %v2992_v45  ;;  %2647 = vst [vmem:[%s4418_s2 + $0x120] sm:$0xff] %v2996_v63  ;;  %v1826_v19 = vadd.f32 %v1825_v52, %v4529_v47  ;;  %v2099_v39 = vmul.bf16 1056980736, %v4499_v9 }
 0x2e1   : > { %v3202_v33 = vpop.eup %3201  ;;  %v2259_v0 = vadd.bf16 1065369472, %v3200_v24  ;;  %v1829_v56 = vpop.f32.mrf.mxu0  ;;  %2644 = vst [vmem:[%s4418_s2 + $0x108] sm:$0xff] %v2993_v27  ;;  %2648 = vst [vmem:[%s4418_s2 + $0x128] sm:$0xff] %v2997_v14  ;;  %v1929_v51 = vadd.f32 %v1928_v8, %v4538_v23  ;;  %v2101_v16 = vmul.bf16 1056980736, %v4501_v46 }
 0x2e2   : > { %v1932_v48 = vpop.f32.mrf.mxu1  ;;  %v3204_v40 = vpop.eup %3203  ;;  %v2261_v36 = vadd.bf16 1065369472, %v3202_v33  ;;  %v4547_v28 = vpack.c.bf16 %v1828_v41, %v1824_v13  ;;  %v4549_v32 = vpack.c.bf16 %v1931_v58, %v1927_v37  ;;  %v1830_v50 = vadd.f32 %v1829_v56, %v4529_v47 }
 0x2e3   : > { %v3206_v57 = vpop.eup %3205  ;;  %v2260_v42 = vadd.bf16 1065369472, %v3204_v40  ;;  %v1933_v22 = vadd.f32 %v1932_v48, %v4538_v23  ;;  %v1833_v29 = vpop.f32.mrf.mxu0  ;;  %v2315_v54 = vmul.bf16 %v2259_v0, %v2091_v4  ;;  %v2100_v27 = vmul.bf16 1056980736, %v4505_v7 }
 0x2e4   : > { %v1936_v35 = vpop.f32.mrf.mxu1  ;;  %v2262_v38 = vadd.bf16 1065369472, %v3206_v57  ;;  %v2111_v1 = vmul.bf16 1060454197, %v4547_v28  ;;  %v2113_v12 = vmul.bf16 1060454197, %v4549_v32  ;;  %v4561_v59 = vpack.c.bf16 %v1830_v50, %v1826_v19 }
 0x2e5   : > { %v2316_v30 = vmul.bf16 %v2260_v42, %v2092_v49  ;;  %v1835_v61 = vpop.f32.mrf.mxu0  ;;  %v2317_v62 = vmul.bf16 %v2261_v36, %v2093_v5  ;;  %v4563_v18 = vpack.c.bf16 %v1933_v22, %v1929_v51  ;;  %v1834_v53 = vadd.f32 %v1833_v29, %v4512_v31 }
 0x2e6   : > { %v1938_v11 = vpop.f32.mrf.mxu1  ;;  %v2318_v15 = vmul.bf16 %v2262_v38, %v2094_v43  ;;  %3215 = verf.bf16 %v2111_v1  ;;  %v2112_v34 = vmul.bf16 1060454197, %v4561_v59  ;;  %v1937_v8 = vadd.f32 %v1936_v35, %v4520_v20 }
 0x2e7   : > { %v3000_v9 = vcombine.low %v2315_v54, %v2316_v30  ;;  %v3004_v26 = vcombine.high %v2315_v54, %v2316_v30  ;;  %3217 = verf.bf16 %v2113_v12  ;;  %v1837_v10 = vpop.f32.mrf.mxu0  ;;  %v3208_v17 = vpop.eup %3207  ;;  %v2114_v52 = vmul.bf16 1060454197, %v4563_v18 }
 0x2e8   : > { %v1940_v6 = vpop.f32.mrf.mxu1  ;;  %v3001_v60 = vcombine.low %v2317_v62, %v2318_v15  ;;  %v3005_v3 = vcombine.high %v2317_v62, %v2318_v15  ;;  %v1836_v46 = vadd.f32 %v1835_v61, %v4529_v47  ;;  %v1939_v4 = vadd.f32 %v1938_v11, %v4538_v23 }
 0x2e9   : > { %2651 = vst [vmem:[%s4418_s2 + $0x140] sm:$0xff] %v3000_v9  ;;  %2655 = vst [vmem:[%s4418_s2 + $0x160] sm:$0xff] %v3004_v26  ;;  %v1839_v5 = vpop.f32.mrf.mxu0  ;;  %v3210_v45 = vpop.eup %3209  ;;  %v2267_v63 = vadd.bf16 1065369472, %v3208_v17  ;;  %3219 = verf.bf16 %v2112_v34  ;;  %v1838_v44 = vadd.f32 %v1837_v10, %v4512_v31  ;;  %v1941_v55 = vadd.f32 %v1940_v6, %v4520_v20 }
 0x2ea   : > { %v1942_v2 = vpop.f32.mrf.mxu1  ;;  %2652 = vst [vmem:[%s4418_s2 + $0x148] sm:$0xff] %v3001_v60  ;;  %2656 = vst [vmem:[%s4418_s2 + $0x168] sm:$0xff] %v3005_v3  ;;  %v3212_v25 = vpop.eup %3211  ;;  %v2269_v24 = vadd.bf16 1065369472, %v3210_v45  ;;  %3221 = verf.bf16 %v2114_v52  ;;  %v1840_v13 = vadd.f32 %v1839_v5, %v4529_v47  ;;  %v2102_v56 = vmul.bf16 1056980736, %v4507_v21 }
 0x2eb   : > { %v1943_v37 = vadd.f32 %v1942_v2, %v4538_v23  ;;  %v1843_v41 = vpop.f32.mrf.mxu0  ;;  %v3214_v33 = vpop.eup %3213  ;;  %v2268_v14 = vadd.bf16 1065369472, %v3212_v25  ;;  %v4581_v0 = vpack.c.bf16 %v1838_v44, %v1834_v53  ;;  %v4583_v49 = vpack.c.bf16 %v1941_v55, %v1937_v8 }
 0x2ec   : > { %v1946_v58 = vpop.f32.mrf.mxu1  ;;  %v2270_v48 = vadd.bf16 1065369472, %v3214_v33  ;;  %v4586_v40 = vpack.c.bf16 %v1840_v13, %v1836_v46  ;;  %v2323_v42 = vmul.bf16 %v2267_v63, %v2099_v39  ;;  %v2325_v22 = vmul.bf16 %v2269_v24, %v2101_v16 }
 0x2ed   : > { %v4588_v36 = vpack.c.bf16 %v1943_v37, %v1939_v4  ;;  %v1845_v50 = vpop.f32.mrf.mxu0  ;;  %v2324_v43 = vmul.bf16 %v2268_v14, %v2100_v27  ;;  %v2119_v19 = vmul.bf16 1060454197, %v4581_v0  ;;  %v2121_v29 = vmul.bf16 1060454197, %v4583_v49 }
 0x2ee   : > { %v1948_v57 = vpop.f32.mrf.mxu1  ;;  %v2326_v7 = vmul.bf16 %v2270_v48, %v2102_v56  ;;  %v2120_v35 = vmul.bf16 1060454197, %v4586_v40  ;;  %v2055_v54 = vmul.bf16 1056980736, %v4547_v28  ;;  %v2057_v62 = vmul.bf16 1056980736, %v4549_v32 }
 0x2ef   : > { %v1847_v21 = vpop.f32.mrf.mxu0  ;;  %v3008_v51 = vcombine.low %v2323_v42, %v2324_v43  ;;  %v3012_v1 = vcombine.high %v2323_v42, %v2324_v43  ;;  %3223 = verf.bf16 %v2119_v19  ;;  %v2122_v12 = vmul.bf16 1060454197, %v4588_v36 }
 0x2f0   : > { %v1950_v38 = vpop.f32.mrf.mxu1  ;;  %v3009_v39 = vcombine.low %v2325_v22, %v2326_v7  ;;  %v3013_v30 = vcombine.high %v2325_v22, %v2326_v7  ;;  %3225 = verf.bf16 %v2121_v29  ;;  %v2056_v15 = vmul.bf16 1056980736, %v4561_v59 }
 0x2f1   : > { %v1849_v61 = vpop.f32.mrf.mxu0  ;;  %2659 = vst [vmem:[%s4418_s2 + $0x180] sm:$0xff] %v3008_v51  ;;  %2663 = vst [vmem:[%s4418_s2 + $0x1a0] sm:$0xff] %v3012_v1  ;;  %3227 = verf.bf16 %v2120_v35  ;;  %v1844_v9 = vadd.f32 %v1843_v41, %v4512_v31  ;;  %v1947_v28 = vadd.f32 %v1946_v58, %v4520_v20  ;;  %v1848_v26 = vadd.f32 %v1847_v21, %v4512_v31 }
 0x2f2   : > { %v1952_v11 = vpop.f32.mrf.mxu1  ;;  %2660 = vst [vmem:[%s4418_s2 + $0x188] sm:$0xff] %v3009_v39  ;;  %2664 = vst [vmem:[%s4418_s2 + $0x1a8] sm:$0xff] %v3013_v30  ;;  %3229 = verf.bf16 %v2122_v12  ;;  %v1951_v16 = vadd.f32 %v1950_v38, %v4520_v20  ;;  %v1846_v3 = vadd.f32 %v1845_v50, %v4529_v47  ;;  %v1949_v32 = vadd.f32 %v1948_v57, %v4538_v23 }
 0x2f3   : > { %v1853_v10 = vpop.f32.mrf.mxu0  ;;  %v1850_v59 = vadd.f32 %v1849_v61, %v4529_v47  ;;  %v1953_v34 = vadd.f32 %v1952_v11, %v4538_v23  ;;  %v2058_v52 = vmul.bf16 1056980736, %v4563_v18  ;;  %v4610_v8 = vpack.c.bf16 %v1848_v26, %v1844_v9 }
 0x2f4   : > { %v1956_v6 = vpop.f32.mrf.mxu1  ;;  %v3216_v60 = vpop.eup %3215  ;;  %v4612_v46 = vpack.c.bf16 %v1951_v16, %v1947_v28  ;;  %v2063_v45 = vmul.bf16 1056980736, %v4581_v0  ;;  %v2065_v55 = vmul.bf16 1056980736, %v4583_v49  ;;  %v1854_v24 = vadd.f32 %v1853_v10, %v4512_v31 }
 0x2f5   : > { %v3218_v53 = vpop.eup %3217  ;;  %v2223_v17 = vadd.bf16 1065369472, %v3216_v60  ;;  %v1855_v4 = vpop.f32.mrf.mxu0  ;;  %v4615_v63 = vpack.c.bf16 %v1850_v59, %v1846_v3  ;;  %v4617_v44 = vpack.c.bf16 %v1953_v34, %v1949_v32  ;;  %v2127_v25 = vmul.bf16 1060454197, %v4610_v8 }
 0x2f6   : > { %v1958_v5 = vpop.f32.mrf.mxu1  ;;  %v2225_v2 = vadd.bf16 1065369472, %v3218_v53  ;;  %v1957_v18 = vadd.f32 %v1956_v6, %v4520_v20  ;;  %v2129_v33 = vmul.bf16 1060454197, %v4612_v46  ;;  %v1856_v14 = vadd.f32 %v1855_v4, %v4529_v47 }
 0x2f7   : > { %v1857_v13 = vpop.f32.mrf.mxu0  ;;  %v3220_v41 = vpop.eup %3219  ;;  %v2279_v58 = vmul.bf16 %v2223_v17, %v2055_v54  ;;  %v2128_v27 = vmul.bf16 1060454197, %v4615_v63  ;;  %3231 = verf.bf16 %v2127_v25  ;;  %v2130_v57 = vmul.bf16 1060454197, %v4617_v44 }
 0x2f8   : > { %v1960_v37 = vpop.f32.mrf.mxu1  ;;  %v3222_v56 = vpop.eup %3221  ;;  %v2281_v48 = vmul.bf16 %v2225_v2, %v2057_v62  ;;  %v2224_v50 = vadd.bf16 1065369472, %v3220_v41  ;;  %3233 = verf.bf16 %v2129_v33  ;;  %v1959_v22 = vadd.f32 %v1958_v5, %v4538_v23 }
 0x2f9   : > { %v1859_v42 = vpop.f32.mrf.mxu0  ;;  %v2226_v19 = vadd.bf16 1065369472, %v3222_v56  ;;  %v1858_v7 = vadd.f32 %v1857_v13, %v4512_v31  ;;  %3235 = verf.bf16 %v2128_v27  ;;  %v1961_v35 = vadd.f32 %v1960_v37, %v4520_v20 }
 0x2fa   : > { %v1962_v43 = vpop.f32.mrf.mxu1  ;;  %v2280_v29 = vmul.bf16 %v2224_v50, %v2056_v15  ;;  %v1860_v21 = vadd.f32 %v1859_v42, %v4529_v47  ;;  %3237 = verf.bf16 %v2130_v57  ;;  %v2064_v16 = vmul.bf16 1056980736, %v4586_v40 }
 0x2fb   : > { %v1863_v38 = vpop.f32.mrf.mxu0  ;;  %v2282_v1 = vmul.bf16 %v2226_v19, %v2058_v52  ;;  %v4631_v54 = vpack.c.bf16 %v1858_v7, %v1854_v24  ;;  %v1963_v39 = vadd.f32 %v1962_v43, %v4538_v23  ;;  %v4634_v61 = vpack.c.bf16 %v1961_v35, %v1957_v18 }
 0x2fc   : > { %v1966_v51 = vpop.f32.mrf.mxu1  ;;  %v2962_v30 = vcombine.low %v2279_v58, %v2280_v29  ;;  %v2966_v12 = vcombine.high %v2279_v58, %v2280_v29  ;;  %v4636_v11 = vpack.c.bf16 %v1860_v21, %v1856_v14  ;;  %v2066_v3 = vmul.bf16 1056980736, %v4588_v36 }
 0x2fd   : > { %v1865_v62 = vpop.f32.mrf.mxu0  ;;  %v3224_v9 = vpop.eup %3223  ;;  %v2963_v28 = vcombine.low %v2281_v48, %v2282_v1  ;;  %v2967_v26 = vcombine.high %v2281_v48, %v2282_v1  ;;  %v2135_v10 = vmul.bf16 1060454197, %v4631_v54  ;;  %v2137_v32 = vmul.bf16 1060454197, %v4634_v61 }
 0x2fe   : > { %v1968_v15 = vpop.f32.mrf.mxu1  ;;  %v3226_v6 = vpop.eup %3225  ;;  %2613 = vst [vmem:[%s4418_s2 + $0x10] sm:$0xff] %v2962_v30  ;;  %2617 = vst [vmem:[%s4418_s2 + $0x30] sm:$0xff] %v2966_v12  ;;  %v2231_v60 = vadd.bf16 1065369472, %v3224_v9  ;;  %v4644_v59 = vpack.c.bf16 %v1963_v39, %v1959_v22  ;;  %v2071_v40 = vmul.bf16 1056980736, %v4610_v8  ;;  %v1864_v33 = vadd.f32 %v1863_v38, %v4512_v31 }
 0x2ff   : > { %v1867_v34 = vpop.f32.mrf.mxu0  ;;  %v3228_v17 = vpop.eup %3227  ;;  %2614 = vst [vmem:[%s4418_s2 + $0x18] sm:$0xff] %v2963_v28  ;;  %2618 = vst [vmem:[%s4418_s2 + $0x38] sm:$0xff] %v2967_v26  ;;  %v2233_v52 = vadd.bf16 1065369472, %v3226_v6  ;;  %3239 = verf.bf16 %v2135_v10  ;;  %v2136_v4 = vmul.bf16 1060454197, %v4636_v11  ;;  %v1967_v27 = vadd.f32 %v1966_v51, %v4520_v20 }
 0x300   : > { %v1970_v53 = vpop.f32.mrf.mxu1  ;;  %v3230_v5 = vpop.eup %3229  ;;  %v2287_v2 = vmul.bf16 %v2231_v60, %v2063_v45  ;;  %v2232_v36 = vadd.bf16 1065369472, %v3228_v17  ;;  %v2073_v25 = vmul.bf16 1056980736, %v4612_v46  ;;  %3241 = verf.bf16 %v2137_v32 }
 0x301   : > { %v1869_v24 = vpop.f32.mrf.mxu0  ;;  %v2289_v13 = vmul.bf16 %v2233_v52, %v2065_v55  ;;  %v2234_v37 = vadd.bf16 1065369472, %v3230_v5  ;;  %3243 = verf.bf16 %v2136_v4  ;;  %v2138_v41 = vmul.bf16 1060454197, %v4644_v59 }
 0x302   : > { %v1972_v18 = vpop.f32.mrf.mxu1  ;;  %v2288_v58 = vmul.bf16 %v2232_v36, %v2064_v16  ;;  %v1866_v0 = vadd.f32 %v1865_v62, %v4529_v47  ;;  %v1969_v49 = vadd.f32 %v1968_v15, %v4538_v23  ;;  %v1868_v55 = vadd.f32 %v1867_v34, %v4512_v31 }
 0x303   : > { %v1873_v45 = vpop.f32.mrf.mxu0  ;;  %v2290_v46 = vmul.bf16 %v2234_v37, %v2066_v3  ;;  %3245 = verf.bf16 %v2138_v41  ;;  %v1971_v50 = vadd.f32 %v1970_v53, %v4520_v20  ;;  %v1870_v57 = vadd.f32 %v1869_v24, %v4529_v47 }
 0x304   : > { %v1976_v14 = vpop.f32.mrf.mxu1  ;;  %v2970_v56 = vcombine.low %v2287_v2, %v2288_v58  ;;  %v2974_v48 = vcombine.high %v2287_v2, %v2288_v58  ;;  %v4665_v7 = vpack.c.bf16 %v1868_v55, %v1864_v33  ;;  %v1973_v29 = vadd.f32 %v1972_v18, %v4538_v23 }
 0x305   : > { %v1875_v42 = vpop.f32.mrf.mxu0  ;;  %v2971_v19 = vcombine.low %v2289_v13, %v2290_v46  ;;  %v2975_v22 = vcombine.high %v2289_v13, %v2290_v46  ;;  %v3232_v35 = vpop.eup %3231  ;;  %v2072_v21 = vmul.bf16 1056980736, %v4615_v63  ;;  %v2074_v38 = vmul.bf16 1056980736, %v4617_v44 }
 0x306   : > { %v4663_v43 = vpop.f32.mrf.mxu1  ;;  %2621 = vst [vmem:[%s4418_s2 + $0x50] sm:$0xff] %v2970_v56  ;;  %2625 = vst [vmem:[%s4418_s2 + $0x70] sm:$0xff] %v2974_v48  ;;  %v4672_v51 = vpack.c.bf16 %v1971_v50, %v1967_v27  ;;  %v4674_v1 = vpack.c.bf16 %v1870_v57, %v1866_v0  ;;  %v3234_v12 = vpop.eup %3233  ;;  %v2239_v62 = vadd.bf16 1065369472, %v3232_v35  ;;  %v2079_v15 = vmul.bf16 1056980736, %v4631_v54 }
 0x307   : > { %v1877_v39 = vpop.f32.mrf.mxu0  ;;  %2622 = vst [vmem:[%s4418_s2 + $0x58] sm:$0xff] %v2971_v19  ;;  %2626 = vst [vmem:[%s4418_s2 + $0x78] sm:$0xff] %v2975_v22  ;;  %v2143_v9 = vmul.bf16 1060454197, %v4665_v7  ;;  %v4680_v28 = vpack.c.bf16 %v1973_v29, %v1969_v49  ;;  %v3236_v26 = vpop.eup %3235  ;;  %v2241_v63 = vadd.bf16 1065369472, %v3234_v12  ;;  %v1874_v32 = vadd.f32 %v1873_v45, %v4512_v31 }
 0x308   : > { %v1980_v30 = vpop.f32.mrf.mxu1  ;;  %v2081_v44 = vmul.bf16 1056980736, %v4634_v61  ;;  %v2145_v16 = vmul.bf16 1060454197, %v4672_v51  ;;  %v3238_v60 = vpop.eup %3237  ;;  %v2240_v3 = vadd.bf16 1065369472, %v3236_v26  ;;  %v1977_v34 = vadd.f32 %v1976_v14, %v4520_v20 }
 0x309   : > { %v1879_v10 = vpop.f32.mrf.mxu0  ;;  %3247 = verf.bf16 %v2143_v9  ;;  %v2242_v54 = vadd.bf16 1065369472, %v3238_v60  ;;  %v2144_v53 = vmul.bf16 1060454197, %v4674_v1  ;;  %v1876_v17 = vadd.f32 %v1875_v42, %v4529_v47 }
 0x30a   : > { %v1982_v6 = vpop.f32.mrf.mxu1  ;;  %3249 = verf.bf16 %v2145_v16  ;;  %v2295_v61 = vmul.bf16 %v2239_v62, %v2071_v40  ;;  %v2297_v5 = vmul.bf16 %v2241_v63, %v2073_v25  ;;  %v2296_v2 = vmul.bf16 %v2240_v3, %v2072_v21 }
 0x30b   : > { %v1883_v52 = vpop.f32.mrf.mxu0  ;;  %v2146_v36 = vmul.bf16 1060454197, %v4680_v28  ;;  %v2298_v24 = vmul.bf16 %v2242_v54, %v2074_v38  ;;  %3251 = verf.bf16 %v2144_v53  ;;  %v1878_v18 = vadd.f32 %v1877_v39, %v4512_v31 }
 0x30c   : > { %v1986_v4 = vpop.f32.mrf.mxu1  ;;  %v1981_v13 = vadd.f32 %v1980_v30, %v4520_v20  ;;  %v2978_v33 = vcombine.low %v2295_v61, %v2296_v2  ;;  %v2982_v27 = vcombine.high %v2295_v61, %v2296_v2  ;;  %v1880_v8 = vadd.f32 %v1879_v10, %v4529_v47 }
 0x30d   : > { %v1885_v37 = vpop.f32.mrf.mxu0  ;;  %v3240_v58 = vpop.eup %3239  ;;  %3253 = verf.bf16 %v2146_v36  ;;  %v2979_v25 = vcombine.low %v2297_v5, %v2298_v24  ;;  %v2983_v0 = vcombine.high %v2297_v5, %v2298_v24  ;;  %v4694_v14 = vpack.c.bf16 %v1878_v18, %v1874_v32 }
 0x30e   : > { %v1988_v41 = vpop.f32.mrf.mxu1  ;;  %v3242_v40 = vpop.eup %3241  ;;  %v2247_v45 = vadd.bf16 1065369472, %v3240_v58  ;;  %2629 = vst [vmem:[%s4418_s2 + $0x90] sm:$0xff] %v2978_v33  ;;  %2633 = vst [vmem:[%s4418_s2 + $0xb0] sm:$0xff] %v2982_v27  ;;  %v4698_v55 = vpack.c.bf16 %v1981_v13, %v1977_v34  ;;  %v4700_v56 = vpack.c.bf16 %v1880_v8, %v1876_v17  ;;  %v1983_v48 = vadd.f32 %v1982_v6, %v4538_v23 }
 0x30f   : > { %v3244_v46 = vpop.eup %3243  ;;  %v2249_v49 = vadd.bf16 1065369472, %v3242_v40  ;;  %2630 = vst [vmem:[%s4418_s2 + $0x98] sm:$0xff] %v2979_v25  ;;  %2634 = vst [vmem:[%s4418_s2 + $0xb8] sm:$0xff] %v2983_v0  ;;  %v2080_v50 = vmul.bf16 1056980736, %v4636_v11  ;;  %v1887_v19 = vpop.f32.mrf.mxu0  ;;  %v1979_v38 = vadd.f32 %v4663_v43, %v4538_v23  ;;  %v1884_v10 = vadd.f32 %v1883_v52, %v4512_v31 }
 0x310   : > { %v2248_v57 = vadd.bf16 1065369472, %v3244_v46  ;;  %v2151_v42 = vmul.bf16 1060454197, %v4694_v14  ;;  %v1990_v22 = vpop.f32.mrf.mxu1  ;;  %v2303_v35 = vmul.bf16 %v2247_v45, %v2079_v15  ;;  %v2082_v21 = vmul.bf16 1056980736, %v4644_v59 }
 0x311   : > { %v3246_v29 = vpop.eup %3245  ;;  %v2153_v39 = vmul.bf16 1060454197, %v4698_v55  ;;  %v2152_v11 = vmul.bf16 1060454197, %v4700_v56  ;;  %v2305_v62 = vmul.bf16 %v2249_v49, %v2081_v44  ;;  %v4712_v9 = vpack.c.bf16 %v1983_v48, %v1979_v38  ;;  %v1889_v59 = vpop.f32.mrf.mxu0 }
 0x312   : > { %v2304_v30 = vmul.bf16 %v2248_v57, %v2080_v50  ;;  %v2250_v12 = vadd.bf16 1065369472, %v3246_v29  ;;  %3255 = verf.bf16 %v2151_v42  ;;  %v1992_v16 = vpop.f32.mrf.mxu1  ;;  %v1987_v6 = vadd.f32 %v1986_v4, %v4520_v20 }
 0x313   : > { %3257 = verf.bf16 %v2153_v39  ;;  %v2154_v43 = vmul.bf16 1060454197, %v4712_v9  ;;  %v1886_v60 = vadd.f32 %v1885_v37, %v4529_v47  ;;  %v1888_v32 = vadd.f32 %v1887_v19, %v4512_v31 }
 0x314   : > { %v2986_v26 = vcombine.low %v2303_v35, %v2304_v30  ;;  %v2990_v15 = vcombine.high %v2303_v35, %v2304_v30  ;;  %v2306_v63 = vmul.bf16 %v2250_v12, %v2082_v21  ;;  %3259 = verf.bf16 %v2152_v11 }
 0x315   : > { %v1991_v34 = vadd.f32 %v1990_v22, %v4520_v20  ;;  %3261 = verf.bf16 %v2154_v43  ;;  %v1989_v53 = vadd.f32 %v1988_v41, %v4538_v23  ;;  %v1890_v17 = vadd.f32 %v1889_v59, %v4529_v47 }
 0x316   : > { %2637 = vst [vmem:[%s4418_s2 + $0xd0] sm:$0xff] %v2986_v26  ;;  %2641 = vst [vmem:[%s4418_s2 + $0xf0] sm:$0xff] %v2990_v15  ;;  %v2987_v44 = vcombine.low %v2305_v62, %v2306_v63  ;;  %v2991_v3 = vcombine.high %v2305_v62, %v2306_v63  ;;  %v1993_v52 = vadd.f32 %v1992_v16, %v4538_v23  ;;  %v2087_v2 = vmul.bf16 1056980736, %v4665_v7 }
 0x317   : > { %v3248_v54 = vpop.eup %3247  ;;  %v4727_v4 = vpack.c.bf16 %v1888_v32, %v1884_v10  ;;  %v4729_v5 = vpack.c.bf16 %v1991_v34, %v1987_v6  ;;  %v4732_v36 = vpack.c.bf16 %v1890_v17, %v1886_v60  ;;  %v2089_v18 = vmul.bf16 1056980736, %v4672_v51 }
 0x318   : > { %v3250_v61 = vpop.eup %3249  ;;  %2638 = vst [vmem:[%s4418_s2 + $0xd8] sm:$0xff] %v2987_v44  ;;  %2642 = vst [vmem:[%s4418_s2 + $0xf8] sm:$0xff] %v2991_v3  ;;  %v2255_v31 = vadd.bf16 1065369472, %v3248_v54  ;;  %v4734_v20 = vpack.c.bf16 %v1993_v52, %v1989_v53  ;;  %v2088_v37 = vmul.bf16 1056980736, %v4674_v1 }
 0x319   : > { %v3252_v24 = vpop.eup %3251  ;;  %v2257_v47 = vadd.bf16 1065369472, %v3250_v61  ;;  %v2159_v23 = vmul.bf16 1060454197, %v4727_v4  ;;  %v2161_v58 = vmul.bf16 1060454197, %v4729_v5 }
 0x31a   : > { %v2256_v41 = vadd.bf16 1065369472, %v3252_v24  ;;  %v2090_v33 = vmul.bf16 1056980736, %v4680_v28  ;;  %v2160_v27 = vmul.bf16 1060454197, %v4732_v36  ;;  %v2311_v8 = vmul.bf16 %v2255_v31, %v2087_v2 }
 0x31b   : > { %v3254_v13 = vpop.eup %3253  ;;  %3263 = verf.bf16 %v2159_v23  ;;  %v2162_v51 = vmul.bf16 1060454197, %v4734_v20  ;;  %v2313_v25 = vmul.bf16 %v2257_v47, %v2089_v18  ;;  %v2095_v42 = vmul.bf16 1056980736, %v4694_v14 }
 0x31c   : > { %v2258_v7 = vadd.bf16 1065369472, %v3254_v13  ;;  %v2312_v40 = vmul.bf16 %v2256_v41, %v2088_v37  ;;  %3265 = verf.bf16 %v2161_v58  ;;  %v2096_v19 = vmul.bf16 1056980736, %v4700_v56 }
 0x31d   : > { %3267 = verf.bf16 %v2160_v27  ;;  %v2097_v39 = vmul.bf16 1056980736, %v4698_v55  ;;  %v2098_v30 = vmul.bf16 1056980736, %v4712_v9  ;;  %v2103_v10 = vmul.bf16 1056980736, %v4727_v4 }
 0x31e   : > { %v2314_v1 = vmul.bf16 %v2258_v7, %v2090_v33  ;;  %v2994_v0 = vcombine.low %v2311_v8, %v2312_v40  ;;  %v2998_v45 = vcombine.high %v2311_v8, %v2312_v40  ;;  %3269 = verf.bf16 %v2162_v51 }
 0x31f   : > { %v2104_v6 = vmul.bf16 1056980736, %v4732_v36  ;;  %v2105_v44 = vmul.bf16 1056980736, %v4729_v5  ;;  %v2106_v3 = vmul.bf16 1056980736, %v4734_v20 }
 0x320   : > { %v3256_v28 = vpop.eup %3255  ;;  %v2995_v46 = vcombine.low %v2313_v25, %v2314_v1  ;;  %v2999_v49 = vcombine.high %v2313_v25, %v2314_v1  ;;  %2645 = vst [vmem:[%s4418_s2 + $0x110] sm:$0xff] %v2994_v0  ;;  %2649 = vst [vmem:[%s4418_s2 + $0x130] sm:$0xff] %v2998_v45 }
 0x321   : > { %v3258_v48 = vpop.eup %3257  ;;  %v2263_v50 = vadd.bf16 1065369472, %v3256_v28 }
 0x322   : > { %v3260_v57 = vpop.eup %3259  ;;  %2646 = vst [vmem:[%s4418_s2 + $0x118] sm:$0xff] %v2995_v46  ;;  %2650 = vst [vmem:[%s4418_s2 + $0x138] sm:$0xff] %v2999_v49  ;;  %v2265_v29 = vadd.bf16 1065369472, %v3258_v48 }
 0x323   : > { %v2264_v22 = vadd.bf16 1065369472, %v3260_v57  ;;  %v3262_v35 = vpop.eup %3261  ;;  %v2319_v21 = vmul.bf16 %v2263_v50, %v2095_v42 }
 0x324   : > { %v2266_v12 = vadd.bf16 1065369472, %v3262_v35  ;;  %v2321_v26 = vmul.bf16 %v2265_v29, %v2097_v39 }
 0x325   : > { %v2320_v38 = vmul.bf16 %v2264_v22, %v2096_v19 }
 0x326   : > { %v2322_v15 = vmul.bf16 %v2266_v12, %v2098_v30 }
 0x327   : > { %v3002_v11 = vcombine.low %v2319_v21, %v2320_v38  ;;  %v3006_v62 = vcombine.high %v2319_v21, %v2320_v38 }
 0x328   : > { %v3003_v56 = vcombine.low %v2321_v26, %v2322_v15  ;;  %v3007_v63 = vcombine.high %v2321_v26, %v2322_v15 }
 0x329   : > { %2653 = vst [vmem:[%s4418_s2 + $0x150] sm:$0xff] %v3002_v11  ;;  %2657 = vst [vmem:[%s4418_s2 + $0x170] sm:$0xff] %v3006_v62  ;;  %v3264_v14 = vpop.eup %3263 }
 0x32a   : > { %v3266_v59 = vpop.eup %3265  ;;  %v2271_v16 = vadd.bf16 1065369472, %v3264_v14  ;;  %2654 = vst [vmem:[%s4418_s2 + $0x158] sm:$0xff] %v3003_v56  ;;  %2658 = vst [vmem:[%s4418_s2 + $0x178] sm:$0xff] %v3007_v63 }
 0x32b   : > { %v3268_v43 = vpop.eup %3267  ;;  %v2273_v55 = vadd.bf16 1065369472, %v3266_v59 }
 0x32c   : > { %v3270_v9 = vpop.eup %3269  ;;  %v2272_v60 = vadd.bf16 1065369472, %v3268_v43  ;;  %v2327_v34 = vmul.bf16 %v2271_v16, %v2103_v10 }
 0x32d   : > { %v2274_v32 = vadd.bf16 1065369472, %v3270_v9  ;;  %v2329_v53 = vmul.bf16 %v2273_v55, %v2105_v44 }
 0x32e   : > { %v2328_v54 = vmul.bf16 %v2272_v60, %v2104_v6 }
 0x32f   : > { %v2330_v17 = vmul.bf16 %v2274_v32, %v2106_v3 }
 0x330   : > { %v3010_v52 = vcombine.low %v2327_v34, %v2328_v54  ;;  %v3014_v61 = vcombine.high %v2327_v34, %v2328_v54 }
 0x331   : > { %v3011_v4 = vcombine.low %v2329_v53, %v2330_v17  ;;  %v3015_v5 = vcombine.high %v2329_v53, %v2330_v17 }
 0x332   : > { %2661 = vst [vmem:[%s4418_s2 + $0x190] sm:$0xff] %v3010_v52  ;;  %2665 = vst [vmem:[%s4418_s2 + $0x1b0] sm:$0xff] %v3014_v61 }
 0x333   : > { %2662 = vst [vmem:[%s4418_s2 + $0x198] sm:$0xff] %v3011_v4  ;;  %2666 = vst [vmem:[%s4418_s2 + $0x1b8] sm:$0xff] %v3015_v5 }
 0x334   : > { %3444 = shalt.err (!%p3441_p11)
}
 0x335   : > { %s3445_s8 = scalar_lea.hbm %s4764_s10, 7168  ;;  %s3449_s0 = scalar_lea.hbm %s4818_s6, 50176 }
 0x336   : > { %p3446_p10 = scmp.ne.s32.totalorder %s4764_s10, %s3445_s8  ;;  %p3450_p8 = scmp.lt.s32.totalorder %s4764_s10, %s4818_s6 }
 0x337   : > { %p3451_p5 = scmp.lt.s32.totalorder %s3449_s0, %s3445_s8 }
 0x338   : > { %p3447_p3 = pnand %p3446_p10, %p3665_p6 }
 0x339   : > { %p3452_p7 = por %p3451_p5, %p3450_p8 }
 0x33a   : > { %p3448_p4 = pneg %p3447_p3 }
 0x33c   : > { %p3453_p12 = pnand %p3452_p7, %p3448_p4 }
 0x33e   : > { %3456 = shalt.err (!%p3453_p12)
}
 0x33f   : > { %s3524_s27 = smov 512   ;;  %s3525_s2 = smov 32  }
 0x340   : > { %3053 = dma.vmem_to_hbm [thread:$0]  (%p3665_p6), %s4766_s9, 7168, %s4764_s10, %s2668_s7, %s3524_s27, %s3524_s27, %s3525_s2  }
 0x341 PF: > { %p3088_p0 = scmp.ge.s32.totalorder %s3511_s24, 2  ;;  %s2697_s20 = sand.u32 1, %s3499_s21  }
 0x342   : > { %p4845_p13 = scmp.ne.s32.totalorder %s4827_s28, 0  ;;  %s2698_s25 = scalar_lea.sflag [#allocation4], %s2697_s20 }
 0x344   : > { %p3076_p1 = pnand %p3088_p0, %p4845_p13 }
 0x346   : > { %p3077_p2 = pneg %p3076_p1 }
 0x348   : > { %3494 = dma.done.wait (%p3077_p2), %s2698_s25, 7168  }
 0x349   : > { %3496 = vsyncadd (%p3077_p2), %s2698_s25, 4294960128  ;;  %p24_p9 = scmp.ge.s32.totalorder %s3655_s12, 9   ;;  %s4846_s21 = smov %s3503_s22 }
 0x34a   : > { %s4847_s22 = smov %s3507_s23  ;;  %s4848_s23 = smov %s3671_s17 }
 0x34b   : > { %s4849_s24 = smov %s3655_s12  ;;  %26 = sbr.rel (!%p24_p9) target bundleno = 13 (0xd), region = 118 }
 0x350   :  { %2703 = vsyncpa [#allocation3], 1 }
 0x351   :  { %2705 = vsyncpa [#allocation3 + $0x1], 1 }
 0x352   :  { %2706 = vsyncpa [#allocation6], 1 }
 0x353   :  { %2708 = vsyncpa [#allocation6 + $0x1], 1 }
 0x354   :  { %2709 = vsyncpa [#allocation9], 1 }
 0x355   :  { %2710 = vsyncpa [#allocation12], 1 }
 0x356   :  { %2711 = vsyncpa [#allocation4], 1 }
 0x357   :  { %2713 = vsyncpa [#allocation4 + $0x1], 1 }

</bundles_post_ra>
